<compile_context>
chip_gen: v7x
topology: tpu7x:2x2x1
jax: 0.10.0
libtpu: 0.0.40
codegen_flags: <defaults>
</compile_context>

<pallas_src>
import jax
import jax.numpy as jnp
from jax.experimental import pallas as pl
from jax.experimental.pallas import tpu as pltpu

STATE_DIM = 4      # CartPole-v0 observation dim
HIDDEN_DIM = 128
TILE_B = 512       # batch lanes per grid step (>=512 amortizes per-step overhead)


def valuenet_kernel(xT_ref, w1t_ref, b1_ref, w2_ref, b2_ref, o_ref):
    """Fused fc1 + ReLU + fc2 for one batch tile; batch on lanes, no MXU.

    xT_ref : (K, TILE_B) states, batch on lanes
    w1t_ref: (H, K)      fc1 weight, hidden on sublanes (VMEM-resident)
    b1_ref : (H, 1)      fc1 bias column
    w2_ref : (H, 1)      fc2 weight column
    b2_ref : (1,)        fc2 bias scalar in SMEM
    o_ref  : (1, TILE_B) lane-dense output slab
    """
    xT = xT_ref[...]                       # (K, B_t)
    w1t = w1t_ref[...]                     # (H, K)
    K = xT_ref.shape[0]

    # fc1: h[j, b] = sum_k w1t[j, k] * xT[k, b] -> K(=4) broadcast FMAs on the VPU
    # (an (B,4)x(4,128) matmul would be almost pure MXU padding, so skip the MXU).
    acc = w1t[:, 0:1] * xT[0:1, :]         # (H, 1) * (1, B_t) -> (H, B_t)
    for k in range(1, K):                  # K is static; unrolled at trace time
        acc = acc + w1t[:, k:k + 1] * xT[k:k + 1, :]
    h = jnp.maximum(acc + b1_ref[...], 0.0)            # + bias, ReLU

    # fc2: multiply by the w2 column and reduce over the hidden (sublane) axis.
    o = jnp.sum(h * w2_ref[...], axis=0, keepdims=True)   # (1, B_t), lane-dense
    o_ref[...] = (o + b2_ref[0]).astype(o_ref.dtype)


def prepare_params(w1, b1, w2, b2):
    """One-time weight re-layout (run at init / after each optimizer step)."""
    H = w1.shape[1]
    w1t = jnp.asarray(w1, jnp.float32).T                     # (H, K)
    b1c = jnp.reshape(jnp.asarray(b1, jnp.float32), (H, 1))  # (H, 1)
    w2c = jnp.reshape(jnp.asarray(w2, jnp.float32), (H, 1))  # (H, 1)
    b2s = jnp.reshape(jnp.asarray(b2, jnp.float32), (1,))    # (1,) -> SMEM scalar
    return w1t, b1c, w2c, b2s


@jax.jit
def value_net_forward(x, w1t, b1c, w2c, b2s):
    """x: (B, state_dim) float. Returns (B, 1) f32, matching the PyTorch module."""
    B, K = x.shape
    H = w1t.shape[0]

    # Lane tile: a multiple of 128, capped at TILE_B; pad batch up to whole tiles.
    tile_b = min(TILE_B, ((B + 127) // 128) * 128)
    Bp = ((B + tile_b - 1) // tile_b) * tile_b

    xT = x.astype(jnp.float32).T                       # (K, B) — fused into this jit
    if Bp != B:
        xT = jnp.pad(xT, ((0, 0), (0, Bp - B)))

    out = pl.pallas_call(
        valuenet_kernel,
        out_shape=jax.ShapeDtypeStruct((1, Bp), jnp.float32),
        grid=(Bp // tile_b,),
        in_specs=[
            pl.BlockSpec((K, tile_b), lambda i: (0, i)),        # streamed per tile
            pl.BlockSpec((H, K), lambda i: (0, 0)),             # VMEM-resident weights
            pl.BlockSpec((H, 1), lambda i: (0, 0)),             # VMEM-resident bias
            pl.BlockSpec((H, 1), lambda i: (0, 0)),             # VMEM-resident weights
            pl.BlockSpec(memory_space=pltpu.MemorySpace.SMEM),  # scalar fc2 bias
        ],
        out_specs=pl.BlockSpec((1, tile_b), lambda i: (0, i)),
        compiler_params=pltpu.CompilerParams(
            dimension_semantics=("parallel",)),                 # use both TCs on v7x
    )(xT, w1t, b1c, w2c, b2s)

    # Lane-dense (1, Bp) slab -> (B, 1) to match the PyTorch module's output shape.
    return out[0, :B].reshape(B, 1)


def init_params(key, state_dim=STATE_DIM, hidden_dim=HIDDEN_DIM):
    # Deterministic synthetic init mimicking PyTorch Linear's U(-1/sqrt(fan_in), ...)
    k1, k2, k3, k4 = jax.random.split(key, 4)
    lim1 = 1.0 / jnp.sqrt(state_dim)
    lim2 = 1.0 / jnp.sqrt(hidden_dim)
    w1 = jax.random.uniform(k1, (state_dim, hidden_dim), jnp.float32, -lim1, lim1)
    b1 = jax.random.uniform(k2, (1, hidden_dim), jnp.float32, -lim1, lim1)
    w2 = jax.random.uniform(k3, (hidden_dim, 1), jnp.float32, -lim2, lim2)
    b2 = jax.random.uniform(k4, (1, 1), jnp.float32, -lim2, lim2)
    return w1, b1, w2, b2


if __name__ == "__main__":
    key = jax.random.PRNGKey(0)
    kx, kp = jax.random.split(key)
    w1, b1, w2, b2 = init_params(kp)
    params = prepare_params(w1, b1, w2, b2)     # one-time weight re-layout

    ref_fwd = lambda x: jnp.maximum(x @ w1 + b1, 0.0) @ w2 + b2

    # Large batch (amortizes fixed overhead) + a small ragged batch (padding path).
    for bidx, B in enumerate((1024, 5)):
        x = jax.random.normal(jax.random.fold_in(kx, bidx), (B, STATE_DIM), jnp.float32)
        out = jax.block_until_ready(value_net_forward(x, *params))
        ref = ref_fwd(x)
        assert out.shape == (B, 1), out.shape
        assert jnp.allclose(out, ref, atol=1e-4, rtol=1e-4)

    print("KERNEL_OK")
</pallas_src>

<mosaic_0001>
module attributes {stable_mosaic.version = 11 : i64} {
  func.func @valuenet_kernel(%arg0: i32, %arg1: memref<4x512xf32, #tpu.memory_space<vmem>>, %arg2: memref<128x4xf32, #tpu.memory_space<vmem>>, %arg3: memref<128x1xf32, #tpu.memory_space<vmem>>, %arg4: memref<128x1xf32, #tpu.memory_space<vmem>>, %arg5: memref<1xf32, #tpu.memory_space<smem>>, %arg6: memref<1x512xf32, #tpu.memory_space<vmem>>) attributes {dimension_semantics = [#tpu.dimension_semantics<parallel>], iteration_bounds = array<i64: 2>, scalar_prefetch = 0 : i64, scratch_operands = 0 : i64, tpu.core_type = #tpu.core_type<tc>, window_params = [{transform_indices = @transform_0, window_bounds = array<i64: 4, 512>}, {pipeline_mode = #tpu.pipeline_mode<synchronous>, transform_indices = @transform_1, window_bounds = array<i64: 128, 4>}, {pipeline_mode = #tpu.pipeline_mode<synchronous>, transform_indices = @transform_2, window_bounds = array<i64: 128, 1>}, {pipeline_mode = #tpu.pipeline_mode<synchronous>, transform_indices = @transform_3, window_bounds = array<i64: 128, 1>}, {transform_indices = @transform_4, window_bounds = array<i64: 1>}, {transform_indices = @transform_5, window_bounds = array<i64: 1, 512>}]} {
    %c0 = arith.constant 0 : index
    %c0_0 = arith.constant 0 : index
    %0 = vector.load %arg1[%c0, %c0_0] : memref<4x512xf32, #tpu.memory_space<vmem>>, vector<4x512xf32>
    %c0_1 = arith.constant 0 : index
    %c0_2 = arith.constant 0 : index
    %1 = vector.load %arg2[%c0_1, %c0_2] : memref<128x4xf32, #tpu.memory_space<vmem>>, vector<128x4xf32>
    %2 = vector.extract_strided_slice %1 {offsets = [0, 0], sizes = [128, 1], strides = [1, 1]} : vector<128x4xf32> to vector<128x1xf32>
    %3 = vector.extract_strided_slice %0 {offsets = [0, 0], sizes = [1, 512], strides = [1, 1]} : vector<4x512xf32> to vector<1x512xf32>
    %4 = vector.broadcast %2 : vector<128x1xf32> to vector<128x512xf32>
    %5 = vector.broadcast %3 : vector<1x512xf32> to vector<128x512xf32>
    %6 = arith.mulf %4, %5 : vector<128x512xf32>
    %7 = vector.extract_strided_slice %1 {offsets = [0, 1], sizes = [128, 1], strides = [1, 1]} : vector<128x4xf32> to vector<128x1xf32>
    %8 = vector.extract_strided_slice %0 {offsets = [1, 0], sizes = [1, 512], strides = [1, 1]} : vector<4x512xf32> to vector<1x512xf32>
    %9 = vector.broadcast %7 : vector<128x1xf32> to vector<128x512xf32>
    %10 = vector.broadcast %8 : vector<1x512xf32> to vector<128x512xf32>
    %11 = arith.mulf %9, %10 : vector<128x512xf32>
    %12 = arith.addf %6, %11 : vector<128x512xf32>
    %13 = vector.extract_strided_slice %1 {offsets = [0, 2], sizes = [128, 1], strides = [1, 1]} : vector<128x4xf32> to vector<128x1xf32>
    %14 = vector.extract_strided_slice %0 {offsets = [2, 0], sizes = [1, 512], strides = [1, 1]} : vector<4x512xf32> to vector<1x512xf32>
    %15 = vector.broadcast %13 : vector<128x1xf32> to vector<128x512xf32>
    %16 = vector.broadcast %14 : vector<1x512xf32> to vector<128x512xf32>
    %17 = arith.mulf %15, %16 : vector<128x512xf32>
    %18 = arith.addf %12, %17 : vector<128x512xf32>
    %19 = vector.extract_strided_slice %1 {offsets = [0, 3], sizes = [128, 1], strides = [1, 1]} : vector<128x4xf32> to vector<128x1xf32>
    %20 = vector.extract_strided_slice %0 {offsets = [3, 0], sizes = [1, 512], strides = [1, 1]} : vector<4x512xf32> to vector<1x512xf32>
    %21 = vector.broadcast %19 : vector<128x1xf32> to vector<128x512xf32>
    %22 = vector.broadcast %20 : vector<1x512xf32> to vector<128x512xf32>
    %23 = arith.mulf %21, %22 : vector<128x512xf32>
    %24 = arith.addf %18, %23 : vector<128x512xf32>
    %c0_3 = arith.constant 0 : index
    %c0_4 = arith.constant 0 : index
    %25 = vector.load %arg3[%c0_3, %c0_4] : memref<128x1xf32, #tpu.memory_space<vmem>>, vector<128x1xf32>
    %26 = vector.broadcast %25 : vector<128x1xf32> to vector<128x512xf32>
    %27 = arith.addf %24, %26 : vector<128x512xf32>
    %cst = arith.constant 0.000000e+00 : f32
    %28 = vector.broadcast %cst : f32 to vector<128x512xf32>
    %29 = arith.maximumf %27, %28 : vector<128x512xf32>
    %c0_5 = arith.constant 0 : index
    %c0_6 = arith.constant 0 : index
    %30 = vector.load %arg4[%c0_5, %c0_6] : memref<128x1xf32, #tpu.memory_space<vmem>>, vector<128x1xf32>
    %31 = vector.broadcast %30 : vector<128x1xf32> to vector<128x512xf32>
    %32 = arith.mulf %29, %31 : vector<128x512xf32>
    %cst_7 = arith.constant dense<0.000000e+00> : vector<512xf32>
    %33 = vector.multi_reduction <add>, %32, %cst_7 [0] : vector<128x512xf32> to vector<512xf32>
    %34 = vector.shape_cast %33 : vector<512xf32> to vector<1x512xf32>
    %c0_8 = arith.constant 0 : index
    %35 = memref.load %arg5[%c0_8] : memref<1xf32, #tpu.memory_space<smem>>
    %36 = vector.broadcast %35 : f32 to vector<1x512xf32>
    %37 = arith.addf %34, %36 : vector<1x512xf32>
    %c0_9 = arith.constant 0 : index
    %c0_10 = arith.constant 0 : index
    %38 = vector.load %arg6[%c0_9, %c0_10] : memref<1x512xf32, #tpu.memory_space<vmem>>, vector<1x512xf32>
    tpu.vector_store %arg6[%c0_9, %c0_10], %37 {strides = array<i32>} : memref<1x512xf32, #tpu.memory_space<vmem>>, vector<1x512xf32>,
    return
  }
  func.func @transform_0(%arg0: i32) -> (i32, i32) {
    %c0_i32 = arith.constant 0 : i32
    %c0_i32_0 = arith.constant 0 : i32
    return %c0_i32, %arg0 : i32, i32
  }
  func.func @transform_1(%arg0: i32) -> (i32, i32) {
    %c0_i32 = arith.constant 0 : i32
    %c0_i32_0 = arith.constant 0 : i32
    %c0_i32_1 = arith.constant 0 : i32
    return %c0_i32, %c0_i32_0 : i32, i32
  }
  func.func @transform_2(%arg0: i32) -> (i32, i32) {
    %c0_i32 = arith.constant 0 : i32
    %c0_i32_0 = arith.constant 0 : i32
    %c0_i32_1 = arith.constant 0 : i32
    return %c0_i32, %c0_i32_0 : i32, i32
  }
  func.func @transform_3(%arg0: i32) -> (i32, i32) {
    %c0_i32 = arith.constant 0 : i32
    %c0_i32_0 = arith.constant 0 : i32
    %c0_i32_1 = arith.constant 0 : i32
    return %c0_i32, %c0_i32_0 : i32, i32
  }
  func.func @transform_4(%arg0: i32) -> i32 {
    %c0_i32 = arith.constant 0 : i32
    %c0_i32_0 = arith.constant 0 : i32
    return %c0_i32 : i32
  }
  func.func @transform_5(%arg0: i32) -> (i32, i32) {
    %c0_i32 = arith.constant 0 : i32
    %c0_i32_0 = arith.constant 0 : i32
    return %c0_i32, %arg0 : i32, i32
  }
}

</mosaic_0001>

<bundles_post_ra>
// kernel: value_net_forward.1
= control target key start
LH: loop header
LB: loop body
LE: loop exit
PB: predicated region body
PF: predicated region fallthrough
CT: control target
= control target key end

     0   :  { %s3399_s0 = inlined_call_operand.vmem [shape: f32[4,1024], index: 0, kind: input, shape index: {}]   ;;  %s3400_s1 = inlined_call_operand.vmem [shape: f32[128,4], index: 1, kind: input, shape index: {}]   ;;  %s3401_s2 = inlined_call_operand.vmem [shape: f32[128,1], index: 2, kind: input, shape index: {}]   ;;  %s3402_s3 = inlined_call_operand.vmem [shape: f32[128,1], index: 3, kind: input, shape index: {}]   ;;  %s3403_s4 = inlined_call_operand.<no memory space> [shape: f32[1], index: 4, kind: input, shape index: {}]   ;;  %s3404_s5 = inlined_call_operand.hbm [shape: f32[1,1024], index: 5, kind: output, shape index: {}]  }
   0x1   :  { %10 = sst [smem:[#allocation2]] %s3403_s4 }
   0x2   :  { %11 = vsyncpa [#allocation4], 0 }
   0x3   :  { %13 = vsyncpa [#allocation4 + $0x1], 0  ;;  %s1862_s20 = smov 0   ;;  %s1864_s21 = smov 0  }
   0x4   :  { %s1866_s22 = smov 0   ;;  %s1868_s23 = smov 0  }
   0x5 LB: > { %s1883_s4 = sadd.s32 4294967295, %s1821_s23   ;;  %s1693_s24 = sadd.s32 4294967294, %s1821_s23   ;;  %s1821_s23 = sphi %s1868_s23, %s3707_s23   ;;  %s1817_s22 = sphi %s1866_s22, %s3706_s22   ;;  %s1813_s21 = sphi %s1864_s21, %s3705_s21   ;;  %s1809_s20 = sphi %s1862_s20, %s3704_s20  }
   0x6   : > { %s1887_s25 = sadd.s32 1, %s1821_s23   ;;  %s136_s26 = sadd.s32 1, %s1817_s22 }
   0x7   : > { %s133_s27 = ssub.s32 %s1821_s23, %s1887_s25  ;;  %p146_p0 = scmp.ne.s32.totalorder %s1817_s22, %s1813_s21 }
   0x8   : > { %p134_p1 = scmp.eq.s32.totalorder %s133_s27, 0  ;;  %p147_p2 = scmp.eq.s32.totalorder %s1883_s4, 1 }
   0x9   : > { %p152_p3 = scmp.ne.s32.totalorder %s1813_s21, %s1809_s20  ;;  %p153_p4 = scmp.eq.s32.totalorder %s1693_s24, 1 }
   0xa   : > { %s1898_s28 = scalar_select %p134_p1, %s1817_s22, %s136_s26  }
   0xb   : > { %p1900_p5 = por %p147_p2, %p146_p0  ;;  %p1904_p6 = por %p153_p4, %p152_p3 }
   0xc   : > { %p1696_p7 = scmp.ge.s32.totalorder %s1821_s23, 1  ;;  %p192_p8 = scmp.lt.s32.totalorder %s1821_s23, 3 }
   0xe   : > { %p193_p9 = pnand %p1696_p7, %p192_p8 }
  0x10   : > { %196 = sbr.rel (%p193_p9) target bundleno = 409 (0x199), region = 40 }
  0x17   : > { %v1913_v0 = vld [vmem:[%s3400_s1 + $0x10] sm:$0xff]  ;;  %v1918_v1 = vld [vmem:[%s3400_s1] sm:$0xff]  ;;  %v1823_v2 = vmov 1   ;;  %v1824_v3 = vmov 0   ;;  %v232_v4 = vld [vmem:[%s3400_s1 + $0x18] sm:$0xff]  ;;  %v1825_v12 = vmov 2   ;;  %v3405_v20 = vlaneseq }
  0x18   : > { %1751 = vset.pattern.permute.xlu0 %v1823_v2  ;;  %1750 = vset.pattern.permute.xlu1 %v1824_v3  ;;  %v234_v5 = vld [vmem:[%s3400_s1 + $0x28] sm:$0xff]  ;;  %v236_v6 = vld [vmem:[%s3400_s1 + $0x38] sm:$0xff]  ;;  %v233_v13 = vld [vmem:[%s3400_s1 + $0x20] sm:$0xff]  ;;  %v1826_v19 = vmov 3   ;;  %s1698_s26 = sshll.u32 %s1883_s4, 2  ;;  %s217_s6 = sand.u32 1, %s1813_s21  }
  0x19   : > { %257 = vperm.xlu1 %1750, %v1913_v0   ;;  %428 = vperm.xlu0 %1751, %v1918_v1   ;;  %v238_v7 = vld [vmem:[%s3400_s1 + $0x48] sm:$0xff]  ;;  %v240_v8 = vld [vmem:[%s3400_s1 + $0x58] sm:$0xff]  ;;  %v235_v14 = vld [vmem:[%s3400_s1 + $0x30] sm:$0xff]  ;;  %p221_p10 = scmp.lt.s32.totalorder %s1698_s26, 7  ;;  %v1982_v21 = vshrl.u32 %v3405_v20, 7  ;;  %s1697_s7 = sshll.u32 %s217_s6, 2 }
  0x1a   : > { %v242_v9 = vld [vmem:[%s3400_s1 + $0x68] sm:$0xff]  ;;  %v244_v10 = vld [vmem:[%s3400_s1 + $0x78] sm:$0xff]  ;;  %v237_v15 = vld [vmem:[%s3400_s1 + $0x40] sm:$0xff]  ;;  %s219_s9 = scalar_lea.vmem [#allocation3], %s1697_s7  ;;  %s1620_s14 = scalar_lea.sflag [#allocation4], %s217_s6 }
  0x1b   : > { %v230_v11 = vld [vmem:[%s3400_s1 + $0x8] sm:$0xff]  ;;  %v239_v16 = vld [vmem:[%s3400_s1 + $0x50] sm:$0xff]  ;;  %v1963_v17 = vld [vmem:[%s3400_s1 + $0x60] sm:$0xff]  ;;  %s3709_s26 = smov (!%p221_p10, %s1698_s26), 7  ;;  %3409 = vst [vmem:[#allocation6_spill] sm:$0xff] %v1982_v21  ;;  %v493_v22 = vsub.s32 1, %v1982_v21 }
  0x1c   : > { %v1969_v18 = vld [vmem:[%s3400_s1 + $0x70] sm:$0xff]  ;;  %s1699_s27 = sshll.u32 %s3709_s26, 2  ;;  %v497_v23 = vsub.s32 5, %v1982_v21  ;;  %v329_v24 = vsub.s32 0, %v1982_v21  ;;  %v333_v25 = vsub.s32 4, %v1982_v21  ;;  %v1112_v28 = vld [vmem:[%s3401_s2 + $0x8] sm:$0xff] }
  0x1d   : > { %262 = vperm.xlu1 %1750, %v232_v4   ;;  %440 = vperm.xlu0 %1751, %v232_v4   ;;  %s224_s8 = scalar_lea.vmem %s3399_s0, %s1699_s27  ;;  %v1335_v39 = vld [vmem:[%s3402_s3] sm:$0xff]  ;;  %s1579_s27 = sld [smem:[#allocation2]] }
  0x1e   : > { %v1993_v26 = vld [vmem:[%s224_s8] sm:$0xff]  ;;  %v1995_v27 = vld [vmem:[%s224_s8 + $0x8] sm:$0xff]  ;;  %s1705_s8 = sshll.u32 %s1883_s4, 6  ;;  %s1634_s10 = sshll.u32 %s219_s9, 4  ;;  %s3359_s10 = int_to_ptr.vmem [resolvable:$true] %s1634_s10 }
  0x1f   : > { %v494_v29 = vrot.slane %v1993_v26, %v493_v22  ;;  %v498_v30 = vrot.slane %v1993_v26, %v497_v23  ;;  %v502_v31 = vrot.slane %v1995_v27, %v493_v22  ;;  %v506_v32 = vrot.slane %v1995_v27, %v497_v23  ;;  %v1115_v58 = vld [vmem:[%s3401_s2 + $0x20] sm:$0xff]  ;;  %s3357_s13 = scalar_lea.hbm %s3404_s5, %s1705_s8  ;;  %s1759_s15 = scalar_lea.vmem %s3359_s10, 64 }
  0x20   : > { %v330_v33 = vrot.slane %v1993_v26, %v329_v24  ;;  %v334_v34 = vrot.slane %v1993_v26, %v333_v25  ;;  %v338_v35 = vrot.slane %v1995_v27, %v329_v24  ;;  %v342_v36 = vrot.slane %v1995_v27, %v333_v25  ;;  %v1111_v59 = vld [vmem:[%s3401_s2] sm:$0xff]  ;;  %p1760_p11 = scmp.ne.s32.totalorder %s3359_s10, %s1759_s15  ;;  %s1828_s4 = smov [#allocation3]  }
  0x21   : > { %272 = vperm.xlu1 %1750, %v234_v5   ;;  %448 = vperm.xlu0 %1751, %v234_v5   ;;  %v2016_v40 = vrot.slane %v494_v29, %v493_v22  ;;  %v2018_v41 = vrot.slane %v498_v30, %v493_v22  ;;  %v2020_v42 = vrot.slane %v502_v31, %v493_v22  ;;  %v1117_v30 = vld [vmem:[%s3401_s2 + $0x30] sm:$0xff]  ;;  %v1114_v31 = vld [vmem:[%s3401_s2 + $0x18] sm:$0xff]  ;;  %s1763_s16 = sshll.u32 %s1828_s4, 4  ;;  %s1764_s16 = int_to_ptr.vmem [resolvable:$false] %s1763_s16 }
  0x22   : > { %v2022_v43 = vrot.slane %v506_v32, %v493_v22  ;;  %v2024_v44 = vrot.slane %v330_v33, %v329_v24  ;;  %v2026_v45 = vrot.slane %v334_v34, %v329_v24  ;;  %v2028_v46 = vrot.slane %v338_v35, %v329_v24  ;;  %p1761_p12 = pnand %p1760_p11, %p1900_p5  ;;  %s1765_s17 = scalar_lea.vmem %s1764_s16, 128 }
  0x23   : > { %v2030_v47 = vrot.slane %v342_v36, %v329_v24  ;;  %p1766_p0 = scmp.lt.s32.totalorder %s3359_s10, %s1764_s16  ;;  %p1767_p1 = scmp.lt.s32.totalorder %s1765_s17, %s1759_s15 }
  0x24   : > { %p1762_p13 = pneg %p1761_p12 }
  0x25   : > { %282 = vperm.xlu1 %1750, %v236_v6   ;;  %456 = vperm.xlu0 %1751, %v236_v6   ;;  %p1768_p2 = por %p1767_p1, %p1766_p0 }
  0x27   : > { %p1769_p3 = pnand %p1768_p2, %p1762_p13 }
  0x29   : > { %292 = vperm.xlu1 %1750, %v238_v7   ;;  %464 = vperm.xlu0 %1751, %v238_v7  }
  0x2d   : > { %302 = vperm.xlu1 %1750, %v240_v8   ;;  %472 = vperm.xlu0 %1751, %v240_v8  }
  0x31   : > { %312 = vperm.xlu1 %1750, %v242_v9   ;;  %480 = vperm.xlu0 %1751, %v242_v9  }
  0x35   : > { %322 = vperm.xlu1 %1750, %v244_v10   ;;  %488 = vperm.xlu0 %1751, %v244_v10  }
  0x39   : > { %1752 = vset.pattern.permute.xlu1 %v1823_v2  ;;  %1754 = vset.pattern.permute.xlu0 %v1825_v12 }
  0x3a   : > { %432 = vperm.xlu1 %1752, %v230_v11   ;;  %660 = vperm.xlu0 %1754, %v230_v11  }
  0x3e   : > { %436 = vperm.xlu1 %1752, %v1913_v0   ;;  %672 = vperm.xlu0 %1754, %v233_v13  }
  0x42   : > { %444 = vperm.xlu1 %1752, %v233_v13   ;;  %680 = vperm.xlu0 %1754, %v235_v14  }
  0x46   : > { %452 = vperm.xlu1 %1752, %v235_v14   ;;  %688 = vperm.xlu0 %1754, %v237_v15  }
  0x4a   : > { %460 = vperm.xlu1 %1752, %v237_v15   ;;  %696 = vperm.xlu0 %1754, %v239_v16  }
  0x4e   : > { %468 = vperm.xlu1 %1752, %v239_v16   ;;  %704 = vperm.xlu0 %1754, %v1963_v17  }
  0x52   : > { %476 = vperm.xlu1 %1752, %v1963_v17   ;;  %712 = vperm.xlu0 %1754, %v1969_v18  }
  0x56   : > { %484 = vperm.xlu1 %1752, %v1969_v18   ;;  %1755 = vset.pattern.permute.xlu0 %v1826_v19 }
  0x57   : > { %884 = vperm.xlu0 %1755, %v1918_v1  }
  0x5a   : > { %1753 = vset.pattern.permute.xlu1 %v1825_v12 }
  0x5b   : > { %656 = vperm.xlu1 %1753, %v1918_v1   ;;  %896 = vperm.xlu0 %1755, %v232_v4  }
  0x5f   : > { %664 = vperm.xlu1 %1753, %v1913_v0   ;;  %904 = vperm.xlu0 %1755, %v234_v5  }
  0x63   : > { %668 = vperm.xlu1 %1753, %v232_v4   ;;  %912 = vperm.xlu0 %1755, %v236_v6  }
  0x67   : > { %676 = vperm.xlu1 %1753, %v234_v5   ;;  %920 = vperm.xlu0 %1755, %v238_v7  }
  0x6b   : > { %684 = vperm.xlu1 %1753, %v236_v6   ;;  %928 = vperm.xlu0 %1755, %v240_v8  }
  0x6f   : > { %692 = vperm.xlu1 %1753, %v238_v7   ;;  %936 = vperm.xlu0 %1755, %v242_v9  }
  0x73   : > { %700 = vperm.xlu1 %1753, %v240_v8   ;;  %944 = vperm.xlu0 %1755, %v244_v10  }
  0x77   : > { %708 = vperm.xlu1 %1753, %v242_v9   ;;  %1757 = vset.pattern.permute.xlu0 %v1824_v3 }
  0x78   : > { %247 = vperm.xlu0 %1757, %v1918_v1  }
  0x7b   : > { %716 = vperm.xlu1 %1753, %v244_v10  }
  0x7c   : > { %252 = vperm.xlu0 %1757, %v230_v11  }
  0x7f   : > { %1756 = vset.pattern.permute.xlu1 %v1826_v19 }
  0x80   : > { %888 = vperm.xlu1 %1756, %v230_v11   ;;  %267 = vperm.xlu0 %1757, %v233_v13   ;;  %v1113_v11 = vld [vmem:[%s3401_s2 + $0x10] sm:$0xff] }
  0x84   : > { %892 = vperm.xlu1 %1756, %v1913_v0   ;;  %277 = vperm.xlu0 %1757, %v235_v14  }
  0x88   : > { %900 = vperm.xlu1 %1756, %v233_v13   ;;  %287 = vperm.xlu0 %1757, %v237_v15  }
  0x8c   : > { %908 = vperm.xlu1 %1756, %v235_v14   ;;  %297 = vperm.xlu0 %1757, %v239_v16  }
  0x90   : > { %916 = vperm.xlu1 %1756, %v237_v15   ;;  %307 = vperm.xlu0 %1757, %v1963_v17  }
  0x94   : > { %924 = vperm.xlu1 %1756, %v239_v16   ;;  %317 = vperm.xlu0 %1757, %v1969_v18  }
  0x98   : > { %v2008_v37 = vpop.permute.xlu1 %257  ;;  %932 = vperm.xlu1 %1756, %v1963_v17   ;;  %1134 = vperm.xlu0 %1757, %v1112_v28   ;;  %v2011_v38 = vpop.permute.xlu0 %428 }
  0x9c   : > { %v263_v48 = vpop.permute.xlu1 %262  ;;  %940 = vperm.xlu1 %1756, %v1969_v18   ;;  %1353 = vperm.xlu0 %1757, %v1335_v39   ;;  %v441_v49 = vpop.permute.xlu0 %440 }
  0x9d   : > { %v375_v50 = vmul.f32 %v2024_v44, %v263_v48  ;;  %v376_v51 = vmul.f32 %v2026_v45, %v263_v48  ;;  %v377_v52 = vmul.f32 %v2028_v46, %v263_v48  ;;  %v378_v53 = vmul.f32 %v2030_v47, %v263_v48 }
  0x9e   : > { %v539_v54 = vmul.f32 %v2016_v40, %v441_v49  ;;  %v540_v55 = vmul.f32 %v2018_v41, %v441_v49  ;;  %v541_v56 = vmul.f32 %v2020_v42, %v441_v49  ;;  %v542_v57 = vmul.f32 %v2022_v43, %v441_v49 }
  0xa0   : > { %v2047_v60 = vadd.f32 %v539_v54, %v375_v50  ;;  %v2049_v61 = vadd.f32 %v540_v55, %v376_v51  ;;  %v2051_v62 = vadd.f32 %v541_v56, %v377_v52  ;;  %v2053_v63 = vadd.f32 %v542_v57, %v378_v53  ;;  %v273_v0 = vpop.permute.xlu1 %272  ;;  %1758 = vset.pattern.permute.xlu1 %v1824_v3  ;;  %v449_v1 = vpop.permute.xlu0 %448  ;;  %v1116_v3 = vld [vmem:[%s3401_s2 + $0x28] sm:$0xff]  ;;  %v1118_v56 = vld [vmem:[%s3401_s2 + $0x38] sm:$0xff] }
  0xa1   : > { %v383_v2 = vmul.f32 %v2024_v44, %v273_v0  ;;  %v384_v4 = vmul.f32 %v2026_v45, %v273_v0  ;;  %v385_v5 = vmul.f32 %v2028_v46, %v273_v0  ;;  %v386_v6 = vmul.f32 %v2030_v47, %v273_v0  ;;  %1149 = vperm.xlu0 %1757, %v1115_v58   ;;  %v1336_v57 = vld [vmem:[%s3402_s3 + $0x8] sm:$0xff] }
  0xa2   : > { %v547_v7 = vmul.f32 %v2016_v40, %v449_v1  ;;  %v548_v8 = vmul.f32 %v2018_v41, %v449_v1  ;;  %v549_v9 = vmul.f32 %v2020_v42, %v449_v1  ;;  %v550_v10 = vmul.f32 %v2022_v43, %v449_v1  ;;  %1129 = vperm.xlu1 %1758, %v1111_v59  }
  0xa4   : > { %v2070_v12 = vadd.f32 %v547_v7, %v383_v2  ;;  %v2072_v13 = vadd.f32 %v548_v8, %v384_v4  ;;  %v2074_v14 = vadd.f32 %v549_v9, %v385_v5  ;;  %v2076_v15 = vadd.f32 %v550_v10, %v386_v6  ;;  %v283_v16 = vpop.permute.xlu1 %282  ;;  %v457_v17 = vpop.permute.xlu0 %456 }
  0xa5   : > { %v391_v18 = vmul.f32 %v2024_v44, %v283_v16  ;;  %v392_v19 = vmul.f32 %v2026_v45, %v283_v16  ;;  %v393_v22 = vmul.f32 %v2028_v46, %v283_v16  ;;  %v394_v23 = vmul.f32 %v2030_v47, %v283_v16  ;;  %1154 = vperm.xlu0 %1757, %v1116_v3   ;;  %v1119_v16 = vld [vmem:[%s3401_s2 + $0x40] sm:$0xff] }
  0xa6   : > { %v555_v24 = vmul.f32 %v2016_v40, %v457_v17  ;;  %v556_v25 = vmul.f32 %v2018_v41, %v457_v17  ;;  %v557_v28 = vmul.f32 %v2020_v42, %v457_v17  ;;  %v558_v29 = vmul.f32 %v2022_v43, %v457_v17  ;;  %1139 = vperm.xlu1 %1758, %v1113_v11   ;;  %v1337_v17 = vld [vmem:[%s3402_s3 + $0x10] sm:$0xff] }
  0xa8   : > { %v2092_v32 = vadd.f32 %v555_v24, %v391_v18  ;;  %v2094_v33 = vadd.f32 %v556_v25, %v392_v19  ;;  %v2096_v34 = vadd.f32 %v557_v28, %v393_v22  ;;  %v2098_v35 = vadd.f32 %v558_v29, %v394_v23  ;;  %v293_v36 = vpop.permute.xlu1 %292  ;;  %v465_v39 = vpop.permute.xlu0 %464 }
  0xa9   : > { %v399_v48 = vmul.f32 %v2024_v44, %v293_v36  ;;  %v400_v49 = vmul.f32 %v2026_v45, %v293_v36  ;;  %v401_v50 = vmul.f32 %v2028_v46, %v293_v36  ;;  %v402_v51 = vmul.f32 %v2030_v47, %v293_v36  ;;  %1159 = vperm.xlu0 %1757, %v1117_v30  }
  0xaa   : > { %v563_v52 = vmul.f32 %v2016_v40, %v465_v39  ;;  %v564_v53 = vmul.f32 %v2018_v41, %v465_v39  ;;  %v565_v54 = vmul.f32 %v2020_v42, %v465_v39  ;;  %v566_v55 = vmul.f32 %v2022_v43, %v465_v39  ;;  %1144 = vperm.xlu1 %1758, %v1114_v31  }
  0xac   : > { %v2114_v58 = vadd.f32 %v563_v52, %v399_v48  ;;  %v2116_v59 = vadd.f32 %v564_v53, %v400_v49  ;;  %v2118_v0 = vadd.f32 %v565_v54, %v401_v50  ;;  %v2120_v1 = vadd.f32 %v566_v55, %v402_v51  ;;  %v303_v2 = vpop.permute.xlu1 %302  ;;  %v473_v4 = vpop.permute.xlu0 %472  ;;  %v1120_v50 = vld [vmem:[%s3401_s2 + $0x48] sm:$0xff]  ;;  %v1338_v51 = vld [vmem:[%s3402_s3 + $0x18] sm:$0xff] }
  0xad   : > { %v407_v5 = vmul.f32 %v2024_v44, %v303_v2  ;;  %v408_v6 = vmul.f32 %v2026_v45, %v303_v2  ;;  %v409_v7 = vmul.f32 %v2028_v46, %v303_v2  ;;  %v410_v8 = vmul.f32 %v2030_v47, %v303_v2  ;;  %1164 = vperm.xlu0 %1757, %v1118_v56  }
  0xae   : > { %v571_v9 = vmul.f32 %v2016_v40, %v473_v4  ;;  %v572_v10 = vmul.f32 %v2018_v41, %v473_v4  ;;  %v573_v3 = vmul.f32 %v2020_v42, %v473_v4  ;;  %v574_v11 = vmul.f32 %v2022_v43, %v473_v4  ;;  %1358 = vperm.xlu1 %1758, %v1336_v57  }
  0xb0   : > { %v2136_v18 = vadd.f32 %v571_v9, %v407_v5  ;;  %v2138_v19 = vadd.f32 %v572_v10, %v408_v6  ;;  %v2140_v22 = vadd.f32 %v573_v3, %v409_v7  ;;  %v2142_v23 = vadd.f32 %v574_v11, %v410_v8  ;;  %v313_v24 = vpop.permute.xlu1 %312  ;;  %v481_v25 = vpop.permute.xlu0 %480  ;;  %v1121_v3 = vld [vmem:[%s3401_s2 + $0x50] sm:$0xff]  ;;  %v1339_v11 = vld [vmem:[%s3402_s3 + $0x20] sm:$0xff] }
  0xb1   : > { %v415_v28 = vmul.f32 %v2024_v44, %v313_v24  ;;  %v416_v29 = vmul.f32 %v2026_v45, %v313_v24  ;;  %v417_v30 = vmul.f32 %v2028_v46, %v313_v24  ;;  %v418_v31 = vmul.f32 %v2030_v47, %v313_v24  ;;  %1169 = vperm.xlu0 %1757, %v1119_v16  }
  0xb2   : > { %v579_v36 = vmul.f32 %v2016_v40, %v481_v25  ;;  %v580_v39 = vmul.f32 %v2018_v41, %v481_v25  ;;  %v581_v48 = vmul.f32 %v2020_v42, %v481_v25  ;;  %v582_v49 = vmul.f32 %v2022_v43, %v481_v25  ;;  %1363 = vperm.xlu1 %1758, %v1337_v17  }
  0xb4   : > { %v2158_v52 = vadd.f32 %v579_v36, %v415_v28  ;;  %v2160_v53 = vadd.f32 %v580_v39, %v416_v29  ;;  %v2162_v54 = vadd.f32 %v581_v48, %v417_v30  ;;  %v2164_v55 = vadd.f32 %v582_v49, %v418_v31  ;;  %v323_v56 = vpop.permute.xlu1 %322  ;;  %v489_v57 = vpop.permute.xlu0 %488  ;;  %v1122_v30 = vld [vmem:[%s3401_s2 + $0x58] sm:$0xff]  ;;  %v1340_v31 = vld [vmem:[%s3402_s3 + $0x28] sm:$0xff]  ;;  %v1123_v48 = vld [vmem:[%s3401_s2 + $0x60] sm:$0xff] }
  0xb5   : > { %v423_v2 = vmul.f32 %v2024_v44, %v323_v56  ;;  %v424_v4 = vmul.f32 %v2026_v45, %v323_v56  ;;  %v425_v5 = vmul.f32 %v2028_v46, %v323_v56  ;;  %v426_v6 = vmul.f32 %v2030_v47, %v323_v56  ;;  %1174 = vperm.xlu0 %1757, %v1120_v50   ;;  %v1341_v49 = vld [vmem:[%s3402_s3 + $0x30] sm:$0xff] }
  0xb6   : > { %3410 = vst [vmem:[#allocation7_spill] sm:$0xff] %v2158_v52  ;;  %3411 = vst [vmem:[#allocation8_spill] sm:$0xff] %v2160_v53  ;;  %v587_v7 = vmul.f32 %v2016_v40, %v489_v57  ;;  %v588_v8 = vmul.f32 %v2018_v41, %v489_v57  ;;  %v589_v9 = vmul.f32 %v2020_v42, %v489_v57  ;;  %1368 = vperm.xlu1 %1758, %v1338_v51  }
  0xb7   : > { %3412 = vst [vmem:[#allocation9_spill] sm:$0xff] %v2162_v54  ;;  %3413 = vst [vmem:[#allocation10_spill] sm:$0xff] %v2164_v55  ;;  %v590_v10 = vmul.f32 %v2022_v43, %v489_v57  ;;  %v721_v56 = vsub.s32 2, %v1982_v21  ;;  %v725_v57 = vsub.s32 6, %v1982_v21 }
  0xb8   : > { %v2180_v16 = vadd.f32 %v587_v7, %v423_v2  ;;  %v2182_v17 = vadd.f32 %v588_v8, %v424_v4  ;;  %v2184_v24 = vadd.f32 %v589_v9, %v425_v5  ;;  %v1124_v2 = vld [vmem:[%s3401_s2 + $0x68] sm:$0xff]  ;;  %v1342_v4 = vld [vmem:[%s3402_s3 + $0x38] sm:$0xff]  ;;  %v949_v5 = vsub.s32 3, %v1982_v21 }
  0xb9   : > { %v2186_v25 = vadd.f32 %v590_v10, %v426_v6  ;;  %1179 = vperm.xlu0 %1757, %v1121_v3   ;;  %v2188_v28 = vpop.permute.xlu1 %432  ;;  %v2190_v29 = vpop.permute.xlu0 %660  ;;  %v953_v6 = vsub.s32 7, %v1982_v21  ;;  %v722_v9 = vrot.slane %v1993_v26, %v721_v56  ;;  %v726_v10 = vrot.slane %v1993_v26, %v725_v57 }
  0xba   : > { %3414 = vst [vmem:[#allocation11_spill] sm:$0xff] %v2180_v16  ;;  %3415 = vst [vmem:[#allocation12_spill] sm:$0xff] %v2182_v17  ;;  %1373 = vperm.xlu1 %1758, %v1339_v11   ;;  %v730_v3 = vrot.slane %v1995_v27, %v721_v56  ;;  %v1125_v11 = vld [vmem:[%s3401_s2 + $0x70] sm:$0xff]  ;;  %v2314_v54 = vmul.f32 %v2022_v43, %v2188_v28 }
  0xbb   : > { %3416 = vst [vmem:[#allocation13_spill] sm:$0xff] %v2184_v24  ;;  %3417 = vst [vmem:[#allocation14_spill] sm:$0xff] %v2186_v25  ;;  %v962_v20 = vrot.slane %v1995_v27, %v953_v6  ;;  %v2242_v25 = vrot.slane %v722_v9, %v721_v56 }
  0xbc   : > { %v2246_v24 = vrot.slane %v730_v3, %v721_v56  ;;  %v372_v3 = vmul.f32 %v2026_v45, %v2008_v37  ;;  %3425 = vst [vmem:[#allocation22_spill] sm:$0xff] %v2314_v54 }
  0xbd   : > { %1184 = vperm.xlu0 %1757, %v1122_v30   ;;  %v437_v36 = vpop.permute.xlu1 %436  ;;  %v2198_v39 = vpop.permute.xlu0 %672  ;;  %v734_v30 = vrot.slane %v1995_v27, %v725_v57  ;;  %v2244_v57 = vrot.slane %v726_v10, %v721_v56  ;;  %v371_v10 = vmul.f32 %v2024_v44, %v2008_v37 }
  0xbe   : > { %1378 = vperm.xlu1 %1758, %v1340_v31   ;;  %v1343_v31 = vld [vmem:[%s3402_s3 + $0x40] sm:$0xff] }
  0xbf   : > { %v2251_v17 = vrot.slane %v734_v30, %v721_v56  ;;  %v373_v56 = vmul.f32 %v2028_v46, %v2008_v37  ;;  %v2268_v30 = vrot.slane %v962_v20, %v949_v5  ;;  %v2288_v20 = vmul.f32 %v2022_v43, %v2011_v38 }
  0xc0   : > { %v2338_v54 = vmul.f32 %v2244_v57, %v2198_v39 }
  0xc1   : > { %1189 = vperm.xlu0 %1757, %v1123_v48   ;;  %v2206_v50 = vpop.permute.xlu1 %444  ;;  %v2208_v51 = vpop.permute.xlu0 %680  ;;  %v950_v48 = vrot.slane %v1993_v26, %v949_v5  ;;  %3421 = vst [vmem:[#allocation18_spill] sm:$0xff] %v2288_v20  ;;  %v538_v20 = vmul.f32 %v2022_v43, %v437_v36 }
  0xc2   : > { %1383 = vperm.xlu1 %1758, %v1341_v49   ;;  %v954_v49 = vrot.slane %v1993_v26, %v953_v6  ;;  %v1126_v26 = vld [vmem:[%s3401_s2 + $0x78] sm:$0xff]  ;;  %3431 = vst [vmem:[#allocation28_spill] sm:$0xff] %v2338_v54  ;;  %v2358_v54 = vmul.f32 %v2016_v40, %v2206_v50 }
  0xc3   : > { %v2256_v6 = vrot.slane %v950_v48, %v949_v5  ;;  %v2274_v48 = vmul.f32 %v2016_v40, %v2011_v38 }
  0xc4   : > { %3434 = vst [vmem:[#allocation31_spill] sm:$0xff] %v2358_v54 }
  0xc5   : > { %1194 = vperm.xlu0 %1757, %v1124_v2   ;;  %v2220_v7 = vpop.permute.xlu1 %452  ;;  %v2222_v8 = vpop.permute.xlu0 %688  ;;  %v958_v2 = vrot.slane %v1995_v27, %v949_v5  ;;  %v1344_v27 = vld [vmem:[%s3402_s3 + $0x48] sm:$0xff]  ;;  %3418 = vst [vmem:[#allocation15_spill] sm:$0xff] %v2274_v48  ;;  %v537_v48 = vmul.f32 %v2020_v42, %v437_v36 }
  0xc6   : > { %1388 = vperm.xlu1 %1758, %v1342_v4  }
  0xc7   : > { %v2260_v9 = vrot.slane %v958_v2, %v949_v5  ;;  %v2282_v2 = vmul.f32 %v2020_v42, %v2011_v38 }
  0xc9   : > { %1199 = vperm.xlu0 %1757, %v1125_v11   ;;  %v2238_v4 = vpop.permute.xlu1 %460  ;;  %v2240_v21 = vpop.permute.xlu0 %696  ;;  %v2258_v11 = vrot.slane %v954_v49, %v949_v5  ;;  %v2278_v49 = vmul.f32 %v2018_v41, %v2011_v38  ;;  %3420 = vst [vmem:[#allocation17_spill] sm:$0xff] %v2282_v2  ;;  %v536_v5 = vmul.f32 %v2018_v41, %v437_v36 }
  0xca   : > { %1393 = vperm.xlu1 %1758, %v1343_v31   ;;  %v374_v31 = vmul.f32 %v2030_v47, %v2008_v37  ;;  %v535_v37 = vmul.f32 %v2016_v40, %v437_v36  ;;  %v2302_v2 = vmul.f32 %v2018_v41, %v2188_v28  ;;  %v2306_v38 = vmul.f32 %v2020_v42, %v2188_v28 }
  0xcb   : > { %3419 = vst [vmem:[#allocation16_spill] sm:$0xff] %v2278_v49  ;;  %v1349_v49 = vld [vmem:[%s3402_s3 + $0x70] sm:$0xff]  ;;  %v2330_v36 = vmul.f32 %v2251_v17, %v2190_v29  ;;  %v2346_v52 = vadd.f32 %v536_v5, %v372_v3  ;;  %v2373_v3 = vmul.f32 %v2022_v43, %v2206_v50  ;;  %v2401_v5 = vmul.f32 %v2020_v42, %v2220_v7 }
  0xcc   : > { %3423 = vst [vmem:[#allocation20_spill] sm:$0xff] %v2302_v2  ;;  %3424 = vst [vmem:[#allocation21_spill] sm:$0xff] %v2306_v38  ;;  %v2322_v2 = vmul.f32 %v2244_v57, %v2190_v29  ;;  %v2326_v38 = vmul.f32 %v2246_v24, %v2190_v29 }
  0xcd   : > { %1204 = vperm.xlu0 %1757, %v1126_v26   ;;  %v469_v16 = vpop.permute.xlu1 %468  ;;  %v2284_v55 = vpop.permute.xlu0 %704  ;;  %v2298_v26 = vmul.f32 %v2016_v40, %v2188_v28  ;;  %3429 = vst [vmem:[#allocation26_spill] sm:$0xff] %v2330_v36  ;;  %v2334_v28 = vmul.f32 %v2242_v25, %v2198_v39  ;;  %v2354_v36 = vadd.f32 %v538_v20, %v374_v31  ;;  %3437 = vst [vmem:[#allocation34_spill] sm:$0xff] %v2373_v3 }
  0xce   : > { %1398 = vperm.xlu1 %1758, %v1344_v27   ;;  %v1345_v27 = vld [vmem:[%s3402_s3 + $0x50] sm:$0xff]  ;;  %3427 = vst [vmem:[#allocation24_spill] sm:$0xff] %v2322_v2  ;;  %3428 = vst [vmem:[#allocation25_spill] sm:$0xff] %v2326_v38  ;;  %v2344_v38 = vadd.f32 %v535_v37, %v371_v10  ;;  %v2366_v10 = vmul.f32 %v2020_v42, %v2206_v50  ;;  %v2381_v31 = vmul.f32 %v2244_v57, %v2208_v51 }
  0xcf   : > { %3422 = vst [vmem:[#allocation19_spill] sm:$0xff] %v2298_v26  ;;  %v2318_v26 = vmul.f32 %v2242_v25, %v2190_v29  ;;  %3430 = vst [vmem:[#allocation27_spill] sm:$0xff] %v2334_v28  ;;  %v2348_v29 = vadd.f32 %v537_v48, %v373_v56  ;;  %v2352_v28 = vmul.f32 %v2251_v17, %v2198_v39 }
  0xd0   : > { %3436 = vst [vmem:[#allocation33_spill] sm:$0xff] %v2366_v10  ;;  %v2377_v56 = vmul.f32 %v2242_v25, %v2208_v51  ;;  %3439 = vst [vmem:[#allocation36_spill] sm:$0xff] %v2381_v31  ;;  %v2385_v48 = vmul.f32 %v2246_v24, %v2208_v51  ;;  %v2389_v20 = vmul.f32 %v2251_v17, %v2208_v51 }
  0xd1   : > { %3426 = vst [vmem:[#allocation23_spill] sm:$0xff] %v2318_v26  ;;  %v2342_v26 = vmul.f32 %v2246_v24, %v2198_v39  ;;  %1423 = vperm.xlu0 %1757, %v1349_v49   ;;  %v477_v2 = vpop.permute.xlu1 %476  ;;  %v713_v53 = vpop.permute.xlu0 %712  ;;  %3433 = vst [vmem:[#allocation30_spill] sm:$0xff] %v2352_v28  ;;  %v2362_v49 = vmul.f32 %v2018_v41, %v2206_v50  ;;  %v1346_v39 = vld [vmem:[%s3402_s3 + $0x58] sm:$0xff]  ;;  %v2393_v50 = vmul.f32 %v2016_v40, %v2220_v7 }
  0xd2   : > { %1403 = vperm.xlu1 %1758, %v1345_v27   ;;  %3438 = vst [vmem:[#allocation35_spill] sm:$0xff] %v2377_v56  ;;  %3440 = vst [vmem:[#allocation37_spill] sm:$0xff] %v2385_v48  ;;  %v2397_v37 = vmul.f32 %v2018_v41, %v2220_v7  ;;  %v2405_v48 = vmul.f32 %v2022_v43, %v2220_v7  ;;  %v2409_v51 = vmul.f32 %v2242_v25, %v2222_v8 }
  0xd3   : > { %3432 = vst [vmem:[#allocation29_spill] sm:$0xff] %v2342_v26  ;;  %3435 = vst [vmem:[#allocation32_spill] sm:$0xff] %v2362_v49  ;;  %v2417_v31 = vmul.f32 %v2246_v24, %v2222_v8  ;;  %v2421_v28 = vmul.f32 %v2251_v17, %v2222_v8  ;;  %v2425_v7 = vmul.f32 %v2016_v40, %v2238_v4 }
  0xd4   : > { %3441 = vst [vmem:[#allocation38_spill] sm:$0xff] %v2389_v20  ;;  %3442 = vst [vmem:[#allocation39_spill] sm:$0xff] %v2393_v50  ;;  %v2413_v20 = vmul.f32 %v2244_v57, %v2222_v8  ;;  %v2440_v8 = vmul.f32 %v2022_v43, %v2238_v4 }
  0xd5   : > { %3443 = vst [vmem:[#allocation40_spill] sm:$0xff] %v2397_v37  ;;  %3444 = vst [vmem:[#allocation41_spill] sm:$0xff] %v2401_v5  ;;  %v485_v27 = vpop.permute.xlu1 %484 }
  0xd6   : > { %3445 = vst [vmem:[#allocation42_spill] sm:$0xff] %v2405_v48  ;;  %3446 = vst [vmem:[#allocation43_spill] sm:$0xff] %v2409_v51  ;;  %1408 = vperm.xlu1 %1758, %v1346_v39   ;;  %v885_v56 = vpop.permute.xlu0 %884  ;;  %v2429_v51 = vmul.f32 %v2018_v41, %v2238_v4  ;;  %v1347_v39 = vld [vmem:[%s3402_s3 + $0x60] sm:$0xff] }
  0xd7   : > { %3447 = vst [vmem:[#allocation44_spill] sm:$0xff] %v2413_v20  ;;  %3448 = vst [vmem:[#allocation45_spill] sm:$0xff] %v2417_v31  ;;  %v2433_v20 = vmul.f32 %v2020_v42, %v2238_v4  ;;  %v2448_v31 = vmul.f32 %v2244_v57, %v2240_v21  ;;  %v2462_v4 = vmul.f32 %v2018_v41, %v469_v16 }
  0xd8   : > { %3449 = vst [vmem:[#allocation46_spill] sm:$0xff] %v2421_v28  ;;  %3450 = vst [vmem:[#allocation47_spill] sm:$0xff] %v2425_v7  ;;  %v2444_v28 = vmul.f32 %v2242_v25, %v2240_v21  ;;  %v2459_v7 = vmul.f32 %v2016_v40, %v469_v16 }
  0xd9   : > { %3451 = vst [vmem:[#allocation48_spill] sm:$0xff] %v2429_v51  ;;  %3452 = vst [vmem:[#allocation49_spill] sm:$0xff] %v2433_v20  ;;  %v2452_v51 = vmul.f32 %v2246_v24, %v2240_v21  ;;  %v2456_v20 = vmul.f32 %v2251_v17, %v2240_v21  ;;  %v2476_v21 = vmul.f32 %v2244_v57, %v2284_v55 }
  0xda   : > { %3453 = vst [vmem:[#allocation50_spill] sm:$0xff] %v2440_v8  ;;  %3454 = vst [vmem:[#allocation51_spill] sm:$0xff] %v2444_v28  ;;  %v2465_v28 = vmul.f32 %v2020_v42, %v469_v16  ;;  %v2468_v8 = vmul.f32 %v2022_v43, %v469_v16  ;;  %1413 = vperm.xlu1 %1758, %v1347_v39   ;;  %v2487_v16 = vmul.f32 %v2016_v40, %v477_v2 }
  0xdb   : > { %3455 = vst [vmem:[#allocation52_spill] sm:$0xff] %v2448_v31  ;;  %3456 = vst [vmem:[#allocation53_spill] sm:$0xff] %v2452_v51  ;;  %v2472_v31 = vmul.f32 %v2242_v25, %v2284_v55  ;;  %v657_v51 = vpop.permute.xlu1 %656  ;;  %v2499_v39 = vmul.f32 %v2022_v43, %v477_v2 }
  0xdc   : > { %3457 = vst [vmem:[#allocation54_spill] sm:$0xff] %v2456_v20  ;;  %3458 = vst [vmem:[#allocation55_spill] sm:$0xff] %v2459_v7  ;;  %v2480_v20 = vmul.f32 %v2246_v24, %v2284_v55 }
  0xdd   : > { %3459 = vst [vmem:[#allocation56_spill] sm:$0xff] %v2462_v4  ;;  %3460 = vst [vmem:[#allocation57_spill] sm:$0xff] %v2465_v28  ;;  %v897_v4 = vpop.permute.xlu0 %896  ;;  %v2484_v28 = vmul.f32 %v2251_v17, %v2284_v55  ;;  %v2505_v55 = vmul.f32 %v2244_v57, %v713_v53 }
  0xde   : > { %3461 = vst [vmem:[#allocation58_spill] sm:$0xff] %v2468_v8  ;;  %3462 = vst [vmem:[#allocation59_spill] sm:$0xff] %v2472_v31  ;;  %v2490_v31 = vmul.f32 %v2018_v41, %v477_v2  ;;  %v2493_v8 = vmul.f32 %v2020_v42, %v477_v2  ;;  %v2520_v2 = vmul.f32 %v2020_v42, %v485_v27 }
  0xdf   : > { %3463 = vst [vmem:[#allocation60_spill] sm:$0xff] %v2476_v21  ;;  %3464 = vst [vmem:[#allocation61_spill] sm:$0xff] %v2480_v20  ;;  %v1348_v20 = vld [vmem:[%s3402_s3 + $0x68] sm:$0xff]  ;;  %v2502_v21 = vmul.f32 %v2242_v25, %v713_v53  ;;  %v997_v7 = vmul.f32 %v2260_v9, %v897_v4 }
  0xe0   : > { %3465 = vst [vmem:[#allocation62_spill] sm:$0xff] %v2484_v28  ;;  %3466 = vst [vmem:[#allocation63_spill] sm:$0xff] %v2487_v16  ;;  %v2508_v28 = vmul.f32 %v2246_v24, %v713_v53  ;;  %v2517_v16 = vmul.f32 %v2018_v41, %v485_v27  ;;  %1418 = vperm.xlu1 %1758, %v1348_v20   ;;  %v2548_v20 = vmul.f32 %v2244_v57, %v657_v51 }
  0xe1   : > { %3467 = vst [vmem:[#allocation64_spill] sm:$0xff] %v2490_v31  ;;  %3468 = vst [vmem:[#allocation65_spill] sm:$0xff] %v2493_v8  ;;  %v2511_v31 = vmul.f32 %v2251_v17, %v713_v53  ;;  %v2514_v8 = vmul.f32 %v2016_v40, %v485_v27  ;;  %v2532_v53 = vmul.f32 %v2260_v9, %v885_v56  ;;  %v665_v40 = vpop.permute.xlu1 %664 }
  0xe2   : > { %3469 = vst [vmem:[#allocation66_spill] sm:$0xff] %v2499_v39  ;;  %3470 = vst [vmem:[#allocation67_spill] sm:$0xff] %v2502_v21  ;;  %v2523_v21 = vmul.f32 %v2022_v43, %v485_v27  ;;  %v763_v41 = vmul.f32 %v2242_v25, %v665_v40  ;;  %v764_v42 = vmul.f32 %v2244_v57, %v665_v40  ;;  %v1350_v27 = vld [vmem:[%s3402_s3 + $0x78] sm:$0xff] }
  0xe3   : > { %3471 = vst [vmem:[#allocation68_spill] sm:$0xff] %v2505_v55  ;;  %3472 = vst [vmem:[#allocation69_spill] sm:$0xff] %v2508_v28  ;;  %v2526_v55 = vmul.f32 %v2256_v6, %v885_v56  ;;  %v2529_v28 = vmul.f32 %v2258_v11, %v885_v56  ;;  %v766_v43 = vmul.f32 %v2251_v17, %v665_v40 }
  0xe4   : > { %3473 = vst [vmem:[#allocation70_spill] sm:$0xff] %v2511_v31  ;;  %3474 = vst [vmem:[#allocation71_spill] sm:$0xff] %v2514_v8  ;;  %v905_v31 = vpop.permute.xlu0 %904  ;;  %v2551_v8 = vmul.f32 %v2246_v24, %v657_v51  ;;  %v2554_v39 = vadd.f32 %v763_v41, %v2344_v38  ;;  %1428 = vperm.xlu1 %1758, %v1350_v27  }
  0xe5   : > { %3475 = vst [vmem:[#allocation72_spill] sm:$0xff] %v2517_v16  ;;  %3476 = vst [vmem:[#allocation73_spill] sm:$0xff] %v2520_v2  ;;  %v765_v2 = vmul.f32 %v2246_v24, %v665_v40  ;;  %v2545_v16 = vmul.f32 %v2242_v25, %v657_v51  ;;  %v2557_v40 = vadd.f32 %v764_v42, %v2346_v52  ;;  %v669_v38 = vpop.permute.xlu1 %668 }
  0xe6   : > { %3477 = vst [vmem:[#allocation74_spill] sm:$0xff] %v2523_v21  ;;  %3478 = vst [vmem:[#allocation75_spill] sm:$0xff] %v2526_v55  ;;  %v2542_v21 = vmul.f32 %v2268_v30, %v885_v56  ;;  %v2563_v56 = vadd.f32 %v766_v43, %v2354_v36  ;;  %v996_v55 = vmul.f32 %v2258_v11, %v897_v4 }
  0xe7   : > { %3479 = vst [vmem:[#allocation76_spill] sm:$0xff] %v2529_v28  ;;  %3480 = vst [vmem:[#allocation77_spill] sm:$0xff] %v2532_v53  ;;  %v2560_v53 = vadd.f32 %v765_v2, %v2348_v29  ;;  %v995_v28 = vmul.f32 %v2256_v6, %v897_v4  ;;  %v767_v52 = vmul.f32 %v2242_v25, %v669_v38 }
  0xe8   : > { %3481 = vst [vmem:[#allocation78_spill] sm:$0xff] %v2542_v21  ;;  %3482 = vst [vmem:[#allocation79_spill] sm:$0xff] %v2548_v20  ;;  %v2566_v21 = vmul.f32 %v2251_v17, %v657_v51  ;;  %v913_v41 = vpop.permute.xlu0 %912  ;;  %v768_v29 = vmul.f32 %v2244_v57, %v669_v38  ;;  %v769_v2 = vmul.f32 %v2246_v24, %v669_v38 }
  0xe9   : > { %3483 = vst [vmem:[#allocation80_spill] sm:$0xff] %v2551_v8  ;;  %3484 = vst [vmem:[#allocation81_spill] sm:$0xff] %v2554_v39  ;;  %v770_v36 = vmul.f32 %v2251_v17, %v669_v38  ;;  %v998_v51 = vmul.f32 %v2268_v30, %v897_v4  ;;  %v1003_v42 = vmul.f32 %v2256_v6, %v905_v31  ;;  %v677_v5 = vpop.permute.xlu1 %676 }
  0xea   : > { %3485 = vst [vmem:[#allocation82_spill] sm:$0xff] %v2557_v40  ;;  %3486 = vst [vmem:[#allocation83_spill] sm:$0xff] %v2560_v53  ;;  %v1004_v43 = vmul.f32 %v2258_v11, %v905_v31  ;;  %v831_v27 = vadd.f32 %v767_v52, %v2047_v60  ;;  %v832_v53 = vadd.f32 %v768_v29, %v2049_v61 }
  0xeb   : > { %3487 = vst [vmem:[#allocation84_spill] sm:$0xff] %v2563_v56  ;;  %3488 = vst [vmem:[#allocation85_spill] sm:$0xff] %v2566_v21  ;;  %v1005_v56 = vmul.f32 %v2260_v9, %v905_v31  ;;  %v833_v40 = vadd.f32 %v769_v2, %v2051_v62  ;;  %v834_v39 = vadd.f32 %v770_v36, %v2053_v63 }
  0xec   : > { %v1006_v26 = vmul.f32 %v2268_v30, %v905_v31  ;;  %v1011_v38 = vmul.f32 %v2256_v6, %v913_v41  ;;  %v1012_v4 = vmul.f32 %v2258_v11, %v913_v41  ;;  %v1013_v48 = vmul.f32 %v2260_v9, %v913_v41  ;;  %v921_v37 = vpop.permute.xlu0 %920 }
  0xed   : > { %v775_v50 = vmul.f32 %v2242_v25, %v677_v5  ;;  %v776_v60 = vmul.f32 %v2244_v57, %v677_v5  ;;  %v777_v61 = vmul.f32 %v2246_v24, %v677_v5  ;;  %v778_v62 = vmul.f32 %v2251_v17, %v677_v5  ;;  %v685_v49 = vpop.permute.xlu1 %684 }
  0xee   : > { %v1014_v63 = vmul.f32 %v2268_v30, %v913_v41  ;;  %v1019_v31 = vmul.f32 %v2256_v6, %v921_v37  ;;  %v1020_v52 = vmul.f32 %v2258_v11, %v921_v37  ;;  %v1021_v29 = vmul.f32 %v2260_v9, %v921_v37 }
  0xef   : > { %v839_v2 = vadd.f32 %v775_v50, %v2070_v12  ;;  %v840_v36 = vadd.f32 %v776_v60, %v2072_v13  ;;  %v841_v3 = vadd.f32 %v777_v61, %v2074_v14  ;;  %v842_v10 = vadd.f32 %v778_v62, %v2076_v15 }
  0xf0   : > { %v929_v54 = vpop.permute.xlu0 %928  ;;  %v2599_v21 = vadd.f32 %v995_v28, %v831_v27  ;;  %v2601_v5 = vadd.f32 %v996_v55, %v832_v53  ;;  %v2603_v41 = vadd.f32 %v997_v7, %v833_v40  ;;  %v2605_v8 = vadd.f32 %v998_v51, %v834_v39 }
  0xf1   : > { %v783_v20 = vmul.f32 %v2242_v25, %v685_v49  ;;  %v784_v12 = vmul.f32 %v2244_v57, %v685_v49  ;;  %v785_v13 = vmul.f32 %v2246_v24, %v685_v49  ;;  %v786_v14 = vmul.f32 %v2251_v17, %v685_v49  ;;  %v693_v49 = vpop.permute.xlu1 %692 }
  0xf2   : > { %3489 = vst [vmem:[#allocation86_spill] sm:$0xff] %v2599_v21  ;;  %3490 = vst [vmem:[#allocation87_spill] sm:$0xff] %v2601_v5  ;;  %v1022_v15 = vmul.f32 %v2268_v30, %v921_v37  ;;  %v2613_v50 = vmul.f32 %v2256_v6, %v929_v54  ;;  %v2616_v28 = vmul.f32 %v2258_v11, %v929_v54  ;;  %v3577_v21 = vld [vmem:[#allocation65_spill] sm:$0xff] }
  0xf3   : > { %3491 = vst [vmem:[#allocation88_spill] sm:$0xff] %v2603_v41  ;;  %3492 = vst [vmem:[#allocation89_spill] sm:$0xff] %v2605_v8  ;;  %v2619_v7 = vmul.f32 %v2260_v9, %v929_v54  ;;  %v847_v39 = vadd.f32 %v783_v20, %v2092_v32  ;;  %v848_v55 = vadd.f32 %v784_v12, %v2094_v33 }
  0xf4   : > { %3493 = vst [vmem:[#allocation90_spill] sm:$0xff] %v2613_v50  ;;  %3494 = vst [vmem:[#allocation91_spill] sm:$0xff] %v2616_v28  ;;  %v849_v53 = vadd.f32 %v785_v13, %v2096_v34  ;;  %v850_v40 = vadd.f32 %v786_v14, %v2098_v35  ;;  %v937_v51 = vpop.permute.xlu0 %936  ;;  %v2625_v37 = vadd.f32 %v1003_v42, %v839_v2  ;;  %v3561_v50 = vld [vmem:[#allocation47_spill] sm:$0xff] }
  0xf5   : > { %3495 = vst [vmem:[#allocation92_spill] sm:$0xff] %v2619_v7  ;;  %v2627_v27 = vadd.f32 %v1004_v43, %v840_v36  ;;  %v2629_v60 = vadd.f32 %v1005_v56, %v841_v3  ;;  %v2631_v61 = vadd.f32 %v1006_v26, %v842_v10  ;;  %v791_v62 = vmul.f32 %v2242_v25, %v693_v49  ;;  %v701_v2 = vpop.permute.xlu1 %700  ;;  %v3552_v7 = vld [vmem:[#allocation34_spill] sm:$0xff] }
  0xf6   : > { %v792_v32 = vmul.f32 %v2244_v57, %v693_v49  ;;  %v793_v33 = vmul.f32 %v2246_v24, %v693_v49  ;;  %v794_v34 = vmul.f32 %v2251_v17, %v693_v49  ;;  %v2638_v35 = vmul.f32 %v2268_v30, %v929_v54 }
  0xf7   : > { %3496 = vst [vmem:[#allocation93_spill] sm:$0xff] %v2631_v61  ;;  %v2641_v20 = vmul.f32 %v2256_v6, %v937_v51  ;;  %v2644_v42 = vmul.f32 %v2258_v11, %v937_v51  ;;  %v2647_v26 = vmul.f32 %v2260_v9, %v937_v51  ;;  %v855_v10 = vadd.f32 %v791_v62, %v2114_v58 }
  0xf8   : > { %3497 = vst [vmem:[#allocation94_spill] sm:$0xff] %v2638_v35  ;;  %v856_v3 = vadd.f32 %v792_v32, %v2116_v59  ;;  %v857_v56 = vadd.f32 %v793_v33, %v2118_v0  ;;  %v858_v43 = vadd.f32 %v794_v34, %v2120_v1  ;;  %v2653_v54 = vpop.permute.xlu0 %944  ;;  %v2655_v36 = vadd.f32 %v1011_v38, %v847_v39 }
  0xf9   : > { %3498 = vst [vmem:[#allocation95_spill] sm:$0xff] %v2641_v20  ;;  %3499 = vst [vmem:[#allocation96_spill] sm:$0xff] %v2644_v42  ;;  %v2657_v12 = vadd.f32 %v1012_v4, %v848_v55  ;;  %v2659_v13 = vadd.f32 %v1013_v48, %v849_v53  ;;  %v2661_v14 = vadd.f32 %v1014_v63, %v850_v40  ;;  %v709_v40 = vpop.permute.xlu1 %708 }
  0xfa   : > { %3500 = vst [vmem:[#allocation97_spill] sm:$0xff] %v2647_v26  ;;  %3501 = vst [vmem:[#allocation98_spill] sm:$0xff] %v2655_v36  ;;  %v799_v49 = vmul.f32 %v2242_v25, %v701_v2  ;;  %v800_v58 = vmul.f32 %v2244_v57, %v701_v2  ;;  %v801_v59 = vmul.f32 %v2246_v24, %v701_v2  ;;  %v3528_v26 = vld [vmem:[#allocation18_spill] sm:$0xff] }
  0xfb   : > { %3502 = vst [vmem:[#allocation99_spill] sm:$0xff] %v2657_v12  ;;  %3503 = vst [vmem:[#allocation100_spill] sm:$0xff] %v2659_v13  ;;  %v802_v0 = vmul.f32 %v2251_v17, %v701_v2  ;;  %v2668_v1 = vmul.f32 %v2268_v30, %v937_v51  ;;  %v2672_v38 = vmul.f32 %v2256_v6, %v2653_v54  ;;  %v3567_v13 = vld [vmem:[#allocation57_spill] sm:$0xff] }
  0xfc   : > { %3504 = vst [vmem:[#allocation101_spill] sm:$0xff] %v2661_v14  ;;  %v2676_v48 = vmul.f32 %v2258_v11, %v2653_v54  ;;  %v2680_v4 = vmul.f32 %v2260_v9, %v2653_v54  ;;  %v2683_v63 = vadd.f32 %v799_v49, %v2136_v18  ;;  %v2686_v39 = vadd.f32 %v800_v58, %v2138_v19  ;;  %v248_v2 = vpop.permute.xlu0 %247  ;;  %v3523_v58 = vld [vmem:[#allocation10_spill] sm:$0xff] }
  0xfd   : > { %3505 = vst [vmem:[#allocation102_spill] sm:$0xff] %v2668_v1  ;;  %3506 = vst [vmem:[#allocation103_spill] sm:$0xff] %v2672_v38  ;;  %v2689_v55 = vadd.f32 %v801_v59, %v2140_v22  ;;  %v2692_v53 = vadd.f32 %v802_v0, %v2142_v23  ;;  %v2694_v51 = vadd.f32 %v1019_v31, %v855_v10  ;;  %v3517_v10 = vld [vmem:[#allocation7_spill] sm:$0xff]  ;;  %v3527_v38 = vld [vmem:[#allocation17_spill] sm:$0xff]  ;;  %v717_v42 = vpop.permute.xlu1 %716 }
  0xfe   : > { %3507 = vst [vmem:[#allocation104_spill] sm:$0xff] %v2676_v48  ;;  %3508 = vst [vmem:[#allocation105_spill] sm:$0xff] %v2680_v4  ;;  %v2696_v62 = vadd.f32 %v1020_v52, %v856_v3  ;;  %v2698_v32 = vadd.f32 %v1021_v29, %v857_v56  ;;  %v2700_v33 = vadd.f32 %v1022_v15, %v858_v43  ;;  %v3519_v3 = vld [vmem:[#allocation8_spill] sm:$0xff]  ;;  %v3521_v43 = vld [vmem:[#allocation9_spill] sm:$0xff] }
  0xff   : > { %3509 = vst [vmem:[#allocation106_spill] sm:$0xff] %v2683_v63  ;;  %3510 = vst [vmem:[#allocation107_spill] sm:$0xff] %v2686_v39  ;;  %v807_v18 = vmul.f32 %v2242_v25, %v709_v40  ;;  %v808_v19 = vmul.f32 %v2244_v57, %v709_v40  ;;  %v809_v34 = vmul.f32 %v2246_v24, %v709_v40  ;;  %v3525_v0 = vld [vmem:[#allocation15_spill] sm:$0xff]  ;;  %v3526_v4 = vld [vmem:[#allocation16_spill] sm:$0xff] }
 0x100   : > { %3511 = vst [vmem:[#allocation108_spill] sm:$0xff] %v2689_v55  ;;  %3512 = vst [vmem:[#allocation109_spill] sm:$0xff] %v2692_v53  ;;  %v810_v22 = vmul.f32 %v2251_v17, %v709_v40  ;;  %v363_v23 = vmul.f32 %v2024_v44, %v248_v2  ;;  %v364_v31 = vmul.f32 %v2026_v45, %v248_v2 }
 0x101   : > { %3513 = vst [vmem:[#allocation110_spill] sm:$0xff] %v2694_v51  ;;  %3514 = vst [vmem:[#allocation111_spill] sm:$0xff] %v2696_v62  ;;  %v365_v52 = vmul.f32 %v2028_v46, %v248_v2  ;;  %v366_v29 = vmul.f32 %v2030_v47, %v248_v2  ;;  %v2711_v15 = vadd.f32 %v807_v18, %v3517_v10  ;;  %v889_v20 = vpop.permute.xlu1 %888  ;;  %v3563_v62 = vld [vmem:[#allocation49_spill] sm:$0xff] }
 0x102   : > { %3515 = vst [vmem:[#allocation112_spill] sm:$0xff] %v2698_v32  ;;  %3516 = vst [vmem:[#allocation113_spill] sm:$0xff] %v2700_v33  ;;  %v2714_v56 = vadd.f32 %v808_v19, %v3519_v3  ;;  %v2717_v49 = vadd.f32 %v809_v34, %v3521_v43  ;;  %v2720_v59 = vadd.f32 %v810_v22, %v3523_v58  ;;  %v253_v3 = vpop.permute.xlu0 %252  ;;  %v3538_v58 = vld [vmem:[#allocation20_spill] sm:$0xff] }
 0x103   : > { %3518 = vst [vmem:[#allocation7_spill] sm:$0xff] %v2711_v15  ;;  %v591_v40 = vadd.f32 %v3525_v0, %v363_v23  ;;  %v592_v48 = vadd.f32 %v3526_v4, %v364_v31  ;;  %v593_v1 = vadd.f32 %v3527_v38, %v365_v52  ;;  %v594_v2 = vadd.f32 %v3528_v26, %v366_v29  ;;  %v3529_v31 = vld [vmem:[#allocation11_spill] sm:$0xff]  ;;  %v3531_v52 = vld [vmem:[#allocation12_spill] sm:$0xff] }
 0x104   : > { %3520 = vst [vmem:[#allocation8_spill] sm:$0xff] %v2714_v56  ;;  %3522 = vst [vmem:[#allocation9_spill] sm:$0xff] %v2717_v49  ;;  %v815_v18 = vmul.f32 %v2242_v25, %v717_v42  ;;  %v816_v19 = vmul.f32 %v2244_v57, %v717_v42  ;;  %v817_v10 = vmul.f32 %v2246_v24, %v717_v42  ;;  %v3533_v57 = vld [vmem:[#allocation13_spill] sm:$0xff]  ;;  %v3535_v24 = vld [vmem:[#allocation14_spill] sm:$0xff] }
 0x105   : > { %3524 = vst [vmem:[#allocation10_spill] sm:$0xff] %v2720_v59  ;;  %v818_v34 = vmul.f32 %v2251_v17, %v717_v42  ;;  %v367_v22 = vmul.f32 %v2024_v44, %v253_v3  ;;  %v368_v23 = vmul.f32 %v2026_v45, %v253_v3  ;;  %v369_v4 = vmul.f32 %v2028_v46, %v253_v3  ;;  %v3537_v42 = vld [vmem:[#allocation19_spill] sm:$0xff]  ;;  %v3539_v59 = vld [vmem:[#allocation21_spill] sm:$0xff]  ;;  %v3540_v56 = vld [vmem:[#allocation22_spill] sm:$0xff]  ;;  %v893_v35 = vpop.permute.xlu1 %892 }
 0x106   : > { %v370_v38 = vmul.f32 %v2030_v47, %v253_v3  ;;  %v2735_v26 = vadd.f32 %v815_v18, %v3529_v31  ;;  %v2738_v25 = vadd.f32 %v816_v19, %v3531_v52  ;;  %v2741_v29 = vadd.f32 %v817_v10, %v3533_v57  ;;  %v268_v18 = vpop.permute.xlu0 %267  ;;  %v3541_v19 = vld [vmem:[#allocation79_spill] sm:$0xff]  ;;  %v3542_v10 = vld [vmem:[#allocation80_spill] sm:$0xff] }
 0x107   : > { %v2744_v17 = vadd.f32 %v818_v34, %v3535_v24  ;;  %v595_v43 = vadd.f32 %v3537_v42, %v367_v22  ;;  %v596_v0 = vadd.f32 %v3538_v58, %v368_v23  ;;  %v597_v49 = vadd.f32 %v3539_v59, %v369_v4  ;;  %v3543_v34 = vld [vmem:[#allocation85_spill] sm:$0xff]  ;;  %v3562_v33 = vld [vmem:[#allocation48_spill] sm:$0xff] }
 0x108   : > { %3530 = vst [vmem:[#allocation15_spill] sm:$0xff] %v2735_v26  ;;  %3532 = vst [vmem:[#allocation16_spill] sm:$0xff] %v2738_v25  ;;  %v598_v3 = vadd.f32 %v3540_v56, %v370_v38  ;;  %v2751_v31 = vadd.f32 %v2545_v16, %v591_v40  ;;  %v2754_v52 = vadd.f32 %v3541_v19, %v592_v48  ;;  %v3546_v38 = vld [vmem:[#allocation24_spill] sm:$0xff]  ;;  %v3548_v19 = vld [vmem:[#allocation26_spill] sm:$0xff] }
 0x109   : > { %3534 = vst [vmem:[#allocation17_spill] sm:$0xff] %v2741_v29  ;;  %3536 = vst [vmem:[#allocation18_spill] sm:$0xff] %v2744_v17  ;;  %v2757_v57 = vadd.f32 %v3542_v10, %v593_v1  ;;  %v2760_v24 = vadd.f32 %v3543_v34, %v594_v2  ;;  %v2764_v22 = vmul.f32 %v2268_v30, %v2653_v54  ;;  %v3545_v2 = vld [vmem:[#allocation23_spill] sm:$0xff]  ;;  %v3547_v54 = vld [vmem:[#allocation25_spill] sm:$0xff]  ;;  %v901_v55 = vpop.permute.xlu1 %900 }
 0x10a   : > { %v987_v56 = vmul.f32 %v2256_v6, %v889_v20  ;;  %v988_v59 = vmul.f32 %v2258_v11, %v889_v20  ;;  %v989_v16 = vmul.f32 %v2260_v9, %v889_v20  ;;  %v379_v40 = vmul.f32 %v2024_v44, %v268_v18  ;;  %v3550_v29 = vld [vmem:[#allocation32_spill] sm:$0xff]  ;;  %v3551_v26 = vld [vmem:[#allocation33_spill] sm:$0xff]  ;;  %v278_v53 = vpop.permute.xlu0 %277 }
 0x10b   : > { %3544 = vst [vmem:[#allocation11_spill] sm:$0xff] %v2764_v22  ;;  %v380_v48 = vmul.f32 %v2026_v45, %v268_v18  ;;  %v381_v1 = vmul.f32 %v2028_v46, %v268_v18  ;;  %v382_v23 = vmul.f32 %v2030_v47, %v268_v18  ;;  %v823_v4 = vadd.f32 %v3545_v2, %v595_v43  ;;  %v3549_v22 = vld [vmem:[#allocation31_spill] sm:$0xff]  ;;  %v3554_v2 = vld [vmem:[#allocation40_spill] sm:$0xff] }
 0x10c   : > { %v824_v42 = vadd.f32 %v3546_v38, %v596_v0  ;;  %v825_v58 = vadd.f32 %v3547_v54, %v597_v49  ;;  %v826_v10 = vadd.f32 %v3548_v19, %v598_v3  ;;  %v990_v34 = vmul.f32 %v2268_v30, %v889_v20  ;;  %v3555_v54 = vld [vmem:[#allocation41_spill] sm:$0xff] }
 0x10d   : > { %v607_v17 = vadd.f32 %v3549_v22, %v379_v40  ;;  %v608_v25 = vadd.f32 %v3550_v29, %v380_v48  ;;  %v609_v15 = vadd.f32 %v3551_v26, %v381_v1  ;;  %v610_v18 = vadd.f32 %v3552_v7, %v382_v23  ;;  %v3553_v1 = vld [vmem:[#allocation39_spill] sm:$0xff] }
 0x10e   : > { %v2783_v43 = vmul.f32 %v2256_v6, %v893_v35  ;;  %v2786_v0 = vmul.f32 %v2258_v11, %v893_v35  ;;  %v2789_v49 = vmul.f32 %v2260_v9, %v893_v35  ;;  %v387_v20 = vmul.f32 %v2024_v44, %v278_v53 }
 0x10f   : > { %v388_v3 = vmul.f32 %v2026_v45, %v278_v53  ;;  %v389_v29 = vmul.f32 %v2028_v46, %v278_v53  ;;  %v390_v26 = vmul.f32 %v2030_v47, %v278_v53  ;;  %v2796_v22 = vmul.f32 %v2268_v30, %v893_v35  ;;  %v288_v53 = vpop.permute.xlu0 %287  ;;  %v3556_v35 = vld [vmem:[#allocation42_spill] sm:$0xff] }
 0x110   : > { %v2798_v7 = vadd.f32 %v987_v56, %v823_v4  ;;  %v2800_v40 = vadd.f32 %v988_v59, %v824_v42  ;;  %v2802_v48 = vadd.f32 %v989_v16, %v825_v58  ;;  %v2805_v23 = vadd.f32 %v3553_v1, %v387_v20 }
 0x111   : > { %v2808_v38 = vadd.f32 %v3554_v2, %v388_v3  ;;  %v2811_v19 = vadd.f32 %v3555_v54, %v389_v29  ;;  %v2813_v28 = vadd.f32 %v990_v34, %v826_v10  ;;  %v2816_v56 = vadd.f32 %v3556_v35, %v390_v26  ;;  %v3557_v29 = vld [vmem:[#allocation27_spill] sm:$0xff]  ;;  %v3558_v34 = vld [vmem:[#allocation28_spill] sm:$0xff]  ;;  %v3559_v26 = vld [vmem:[#allocation29_spill] sm:$0xff] }
 0x112   : > { %v999_v59 = vmul.f32 %v2256_v6, %v901_v55  ;;  %v1000_v16 = vmul.f32 %v2258_v11, %v901_v55  ;;  %v1001_v4 = vmul.f32 %v2260_v9, %v901_v55  ;;  %v395_v42 = vmul.f32 %v2024_v44, %v288_v53  ;;  %v3560_v54 = vld [vmem:[#allocation30_spill] sm:$0xff] }
 0x113   : > { %v396_v58 = vmul.f32 %v2026_v45, %v288_v53  ;;  %v397_v20 = vmul.f32 %v2028_v46, %v288_v53  ;;  %v398_v3 = vmul.f32 %v2030_v47, %v288_v53  ;;  %v835_v10 = vadd.f32 %v3557_v29, %v607_v17  ;;  %v909_v53 = vpop.permute.xlu1 %908  ;;  %v298_v14 = vpop.permute.xlu0 %297  ;;  %v3564_v17 = vld [vmem:[#allocation50_spill] sm:$0xff] }
 0x114   : > { %v836_v1 = vadd.f32 %v3558_v34, %v608_v25  ;;  %v837_v2 = vadd.f32 %v3559_v26, %v609_v15  ;;  %v838_v35 = vadd.f32 %v3560_v54, %v610_v18  ;;  %v1002_v39 = vmul.f32 %v2268_v30, %v901_v55  ;;  %v3565_v34 = vld [vmem:[#allocation55_spill] sm:$0xff]  ;;  %v3566_v54 = vld [vmem:[#allocation56_spill] sm:$0xff] }
 0x115   : > { %v2831_v63 = vadd.f32 %v3561_v50, %v395_v42  ;;  %v2834_v32 = vadd.f32 %v3562_v33, %v396_v58  ;;  %v2837_v51 = vadd.f32 %v3563_v62, %v397_v20  ;;  %v2840_v29 = vadd.f32 %v3564_v17, %v398_v3 }
 0x116   : > { %v2843_v15 = vmul.f32 %v2256_v6, %v909_v53  ;;  %v2846_v25 = vmul.f32 %v2258_v11, %v909_v53  ;;  %v2849_v50 = vmul.f32 %v2260_v9, %v909_v53  ;;  %v403_v55 = vmul.f32 %v2024_v44, %v298_v14 }
 0x117   : > { %v404_v33 = vmul.f32 %v2026_v45, %v298_v14  ;;  %v405_v62 = vmul.f32 %v2028_v46, %v298_v14  ;;  %v406_v18 = vmul.f32 %v2030_v47, %v298_v14  ;;  %v2856_v42 = vmul.f32 %v2268_v30, %v909_v53  ;;  %v917_v36 = vpop.permute.xlu1 %916  ;;  %v308_v14 = vpop.permute.xlu0 %307  ;;  %v3568_v53 = vld [vmem:[#allocation58_spill] sm:$0xff] }
 0x118   : > { %v2858_v58 = vadd.f32 %v999_v59, %v835_v10  ;;  %v2860_v20 = vadd.f32 %v1000_v16, %v836_v1  ;;  %v2862_v3 = vadd.f32 %v1001_v4, %v837_v2  ;;  %v2865_v26 = vadd.f32 %v3565_v34, %v403_v55 }
 0x119   : > { %v2868_v17 = vadd.f32 %v3566_v54, %v404_v33  ;;  %v2871_v12 = vadd.f32 %v3567_v13, %v405_v62  ;;  %v2873_v8 = vadd.f32 %v1002_v39, %v838_v35  ;;  %v2876_v59 = vadd.f32 %v3568_v53, %v406_v18  ;;  %v3569_v35 = vld [vmem:[#allocation75_spill] sm:$0xff]  ;;  %v3570_v33 = vld [vmem:[#allocation76_spill] sm:$0xff]  ;;  %v3571_v18 = vld [vmem:[#allocation77_spill] sm:$0xff] }
 0x11a   : > { %v2879_v16 = vmul.f32 %v2256_v6, %v917_v36  ;;  %v2882_v4 = vmul.f32 %v2258_v11, %v917_v36  ;;  %v2885_v10 = vmul.f32 %v2260_v9, %v917_v36  ;;  %v411_v1 = vmul.f32 %v2024_v44, %v308_v14  ;;  %v3572_v54 = vld [vmem:[#allocation78_spill] sm:$0xff] }
 0x11b   : > { %v412_v13 = vmul.f32 %v2026_v45, %v308_v14  ;;  %v413_v2 = vmul.f32 %v2028_v46, %v308_v14  ;;  %v414_v39 = vmul.f32 %v2030_v47, %v308_v14  ;;  %v2893_v55 = vadd.f32 %v3569_v35, %v2751_v31  ;;  %v3573_v14 = vld [vmem:[#allocation63_spill] sm:$0xff]  ;;  %v3575_v31 = vld [vmem:[#allocation64_spill] sm:$0xff]  ;;  %v318_v61 = vpop.permute.xlu0 %317 }
 0x11c   : > { %v2897_v62 = vadd.f32 %v3570_v33, %v2754_v52  ;;  %v2901_v34 = vadd.f32 %v3571_v18, %v2757_v57  ;;  %v2905_v53 = vadd.f32 %v3572_v54, %v2760_v24  ;;  %v2908_v41 = vmul.f32 %v2268_v30, %v917_v36  ;;  %v925_v33 = vpop.permute.xlu1 %924  ;;  %v3579_v57 = vld [vmem:[#allocation66_spill] sm:$0xff] }
 0x11d   : > { %v2911_v5 = vadd.f32 %v3573_v14, %v411_v1  ;;  %v2914_v35 = vadd.f32 %v3575_v31, %v412_v13  ;;  %v2917_v52 = vadd.f32 %v3577_v21, %v413_v2  ;;  %v2920_v18 = vadd.f32 %v3579_v57, %v414_v39  ;;  %v3582_v14 = vld [vmem:[#allocation81_spill] sm:$0xff]  ;;  %v3583_v57 = vld [vmem:[#allocation82_spill] sm:$0xff] }
 0x11e   : > { %v2923_v24 = vmul.f32 %v2256_v6, %v925_v33  ;;  %v2926_v36 = vmul.f32 %v2258_v11, %v925_v33  ;;  %v2929_v1 = vmul.f32 %v2260_v9, %v925_v33  ;;  %v419_v13 = vmul.f32 %v2024_v44, %v318_v61 }
 0x11f   : > { %3574 = vst [vmem:[#allocation12_spill] sm:$0xff] %v2911_v5  ;;  %3576 = vst [vmem:[#allocation13_spill] sm:$0xff] %v2914_v35  ;;  %v420_v54 = vmul.f32 %v2026_v45, %v318_v61  ;;  %v421_v21 = vmul.f32 %v2028_v46, %v318_v61  ;;  %v422_v2 = vmul.f32 %v2030_v47, %v318_v61  ;;  %v3585_v45 = vld [vmem:[#allocation71_spill] sm:$0xff]  ;;  %v3587_v46 = vld [vmem:[#allocation72_spill] sm:$0xff] }
 0x120   : > { %3578 = vst [vmem:[#allocation14_spill] sm:$0xff] %v2917_v52  ;;  %3580 = vst [vmem:[#allocation19_spill] sm:$0xff] %v2920_v18  ;;  %v2936_v39 = vmul.f32 %v2268_v30, %v925_v33  ;;  %v2940_v31 = vadd.f32 %v2783_v43, %v3582_v14  ;;  %v2944_v18 = vadd.f32 %v2786_v0, %v3583_v57  ;;  %v3584_v52 = vld [vmem:[#allocation83_spill] sm:$0xff]  ;;  %v3589_v61 = vld [vmem:[#allocation73_spill] sm:$0xff]  ;;  %v933_v5 = vpop.permute.xlu1 %932  ;;  %v1135_v43 = vpop.permute.xlu0 %1134 }
 0x121   : > { %v2948_v44 = vadd.f32 %v2789_v49, %v3584_v52  ;;  %v2951_v35 = vadd.f32 %v3585_v45, %v419_v13  ;;  %v2954_v47 = vadd.f32 %v3587_v46, %v420_v54  ;;  %v2957_v33 = vadd.f32 %v3589_v61, %v421_v21  ;;  %v3591_v14 = vld [vmem:[#allocation84_spill] sm:$0xff]  ;;  %v3592_v0 = vld [vmem:[#allocation74_spill] sm:$0xff]  ;;  %v3594_v45 = vld [vmem:[#allocation35_spill] sm:$0xff] }
 0x122   : > { %3581 = vst [vmem:[#allocation20_spill] sm:$0xff] %v2936_v39  ;;  %v2961_v39 = vadd.f32 %v2796_v22, %v3591_v14  ;;  %v2964_v57 = vadd.f32 %v3592_v0, %v422_v2  ;;  %v2967_v49 = vmul.f32 %v2256_v6, %v933_v5  ;;  %v2970_v52 = vmul.f32 %v2258_v11, %v933_v5  ;;  %v3595_v61 = vld [vmem:[#allocation36_spill] sm:$0xff]  ;;  %v3596_v0 = vld [vmem:[#allocation37_spill] sm:$0xff] }
 0x123   : > { %3586 = vst [vmem:[#allocation21_spill] sm:$0xff] %v2951_v35  ;;  %3588 = vst [vmem:[#allocation22_spill] sm:$0xff] %v2954_v47  ;;  %v2973_v13 = vmul.f32 %v2260_v9, %v933_v5  ;;  %v2976_v54 = vadd.f32 %v1135_v43, %v2798_v7  ;;  %v2979_v21 = vadd.f32 %v1135_v43, %v2800_v40  ;;  %v3597_v7 = vld [vmem:[#allocation38_spill] sm:$0xff] }
 0x124   : > { %3590 = vst [vmem:[#allocation79_spill] sm:$0xff] %v2957_v33  ;;  %3593 = vst [vmem:[#allocation80_spill] sm:$0xff] %v2964_v57  ;;  %v2982_v22 = vadd.f32 %v1135_v43, %v2802_v48  ;;  %v2985_v2 = vadd.f32 %v1135_v43, %v2813_v28  ;;  %v843_v46 = vadd.f32 %v3594_v45, %v2805_v23  ;;  %v941_v47 = vpop.permute.xlu1 %940  ;;  %v1354_v23 = vpop.permute.xlu0 %1353  ;;  %v3602_v45 = vld [vmem:[#allocation43_spill] sm:$0xff] }
 0x125   : > { %v844_v14 = vadd.f32 %v3595_v61, %v2808_v38  ;;  %v845_v57 = vadd.f32 %v3596_v0, %v2811_v19  ;;  %v846_v33 = vadd.f32 %v3597_v7, %v2816_v56  ;;  %v2996_v40 = vmul.f32 %v2268_v30, %v933_v5 }
 0x126   : > { %v3003_v38 = vmul.f32 %v2256_v6, %v941_v47  ;;  %v3006_v19 = vmul.f32 %v2258_v11, %v941_v47  ;;  %v3009_v56 = vmul.f32 %v2260_v9, %v941_v47  ;;  %v3012_v5 = vmul.f32 %v2268_v30, %v941_v47  ;;  %v3603_v6 = vld [vmem:[#allocation44_spill] sm:$0xff]  ;;  %v3604_v11 = vld [vmem:[#allocation45_spill] sm:$0xff]  ;;  %v3605_v9 = vld [vmem:[#allocation46_spill] sm:$0xff] }
 0x127   : > { %v1071_v61 = vadd.f32 %v2843_v15, %v843_v46  ;;  %v1072_v0 = vadd.f32 %v2846_v25, %v844_v14  ;;  %v1073_v7 = vadd.f32 %v2849_v50, %v845_v57  ;;  %v851_v43 = vadd.f32 %v3602_v45, %v2831_v63  ;;  %v3606_v30 = vld [vmem:[#allocation51_spill] sm:$0xff]  ;;  %v3607_v15 = vld [vmem:[#allocation52_spill] sm:$0xff]  ;;  %v3608_v50 = vld [vmem:[#allocation53_spill] sm:$0xff] }
 0x128   : > { %3598 = vst [vmem:[#allocation85_spill] sm:$0xff] %v3003_v38  ;;  %3599 = vst [vmem:[#allocation23_spill] sm:$0xff] %v3006_v19  ;;  %v852_v28 = vadd.f32 %v3603_v6, %v2834_v32  ;;  %v853_v48 = vadd.f32 %v3604_v11, %v2837_v51  ;;  %v3027_v47 = vadd.f32 %v3606_v30, %v2865_v26  ;;  %v3609_v32 = vld [vmem:[#allocation54_spill] sm:$0xff]  ;;  %v1150_v51 = vpop.permute.xlu0 %1149  ;;  %v3610_v11 = vld [vmem:[#allocation93_spill] sm:$0xff] }
 0x129   : > { %3600 = vst [vmem:[#allocation24_spill] sm:$0xff] %v3009_v56  ;;  %3601 = vst [vmem:[#allocation25_spill] sm:$0xff] %v3012_v5  ;;  %v854_v56 = vadd.f32 %v3605_v9, %v2840_v29  ;;  %v3031_v25 = vadd.f32 %v3607_v15, %v2868_v17  ;;  %v3035_v63 = vadd.f32 %v3608_v50, %v2871_v12  ;;  %v3620_v5 = vmax.f32 %v2979_v21, 0.0  ;;  %v3623_v38 = vld [vmem:[#allocation110_spill] sm:$0xff] }
 0x12a   : > { %v3039_v57 = vadd.f32 %v3609_v32, %v2876_v59  ;;  %v1074_v46 = vadd.f32 %v2856_v42, %v846_v33  ;;  %v3043_v29 = vadd.f32 %v2879_v16, %v851_v43  ;;  %v3046_v26 = vadd.f32 %v2882_v4, %v852_v28  ;;  %v1130_v16 = vpop.permute.xlu1 %1129 }
 0x12b   : > { %v3049_v17 = vadd.f32 %v2885_v10, %v853_v48  ;;  %v3052_v14 = vadd.f32 %v1150_v51, %v2858_v58  ;;  %v3055_v12 = vadd.f32 %v1150_v51, %v2860_v20  ;;  %v3058_v59 = vadd.f32 %v1150_v51, %v2862_v3 }
 0x12c   : > { %v3061_v42 = vadd.f32 %v1150_v51, %v2873_v8  ;;  %v1207_v33 = vadd.f32 %v1130_v16, %v2893_v55  ;;  %v1208_v4 = vadd.f32 %v1130_v16, %v2897_v62  ;;  %v1209_v10 = vadd.f32 %v1130_v16, %v2901_v34  ;;  %v1155_v55 = vpop.permute.xlu0 %1154  ;;  %v3614_v51 = vld [vmem:[#allocation89_spill] sm:$0xff] }
 0x12d   : > { %v1210_v48 = vadd.f32 %v1130_v16, %v2905_v53  ;;  %v3071_v3 = vadd.f32 %v2908_v41, %v854_v56  ;;  %v3074_v62 = vadd.f32 %v1155_v55, %v2625_v37  ;;  %v3077_v34 = vadd.f32 %v1155_v55, %v2627_v27  ;;  %v3612_v27 = vld [vmem:[#allocation87_spill] sm:$0xff]  ;;  %v3613_v37 = vld [vmem:[#allocation88_spill] sm:$0xff] }
 0x12e   : > { %v1271_v8 = vmax.f32 %v1207_v33, 0.0  ;;  %v1272_v43 = vmax.f32 %v1208_v4, 0.0  ;;  %v1273_v45 = vmax.f32 %v1209_v10, 0.0  ;;  %v3080_v53 = vadd.f32 %v1155_v55, %v2629_v60  ;;  %v1140_v30 = vpop.permute.xlu1 %1139 }
 0x12f   : > { %v1274_v6 = vmax.f32 %v1210_v48, 0.0  ;;  %v3083_v9 = vadd.f32 %v1155_v55, %v3610_v11  ;;  %v1215_v16 = vadd.f32 %v1140_v30, %v2940_v31  ;;  %v1216_v60 = vadd.f32 %v1140_v30, %v2944_v18  ;;  %v3611_v48 = vld [vmem:[#allocation86_spill] sm:$0xff] }
 0x130   : > { %v1431_v56 = vmul.f32 %v1354_v23, %v1271_v8  ;;  %v1432_v15 = vmul.f32 %v1354_v23, %v1272_v43  ;;  %v1433_v50 = vmul.f32 %v1354_v23, %v1273_v45  ;;  %v1217_v33 = vadd.f32 %v1140_v30, %v2948_v44  ;;  %v1160_v10 = vpop.permute.xlu0 %1159 }
 0x131   : > { %v1434_v32 = vmul.f32 %v1354_v23, %v1274_v6  ;;  %v1218_v4 = vadd.f32 %v1140_v30, %v2961_v39  ;;  %v3094_v8 = vadd.f32 %v1160_v10, %v1071_v61  ;;  %v3096_v23 = vadd.f32 %v1160_v10, %v1072_v0  ;;  %v3618_v39 = vld [vmem:[#allocation101_spill] sm:$0xff] }
 0x132   : > { %v3098_v43 = vadd.f32 %v1160_v10, %v1073_v7  ;;  %v1145_v45 = vpop.permute.xlu1 %1144  ;;  %v1279_v6 = vmax.f32 %v1215_v16, 0.0  ;;  %v1280_v55 = vmax.f32 %v1216_v60, 0.0  ;;  %v1281_v11 = vmax.f32 %v1217_v33, 0.0  ;;  %v3615_v60 = vld [vmem:[#allocation98_spill] sm:$0xff] }
 0x133   : > { %v3100_v31 = vadd.f32 %v1160_v10, %v1074_v46  ;;  %v1282_v18 = vmax.f32 %v1218_v4, 0.0  ;;  %v1219_v61 = vadd.f32 %v1145_v45, %v3611_v48  ;;  %v1220_v0 = vadd.f32 %v1145_v45, %v3612_v27  ;;  %v3616_v46 = vld [vmem:[#allocation99_spill] sm:$0xff]  ;;  %v3617_v10 = vld [vmem:[#allocation100_spill] sm:$0xff] }
 0x134   : > { %v1221_v7 = vadd.f32 %v1145_v45, %v3613_v37  ;;  %v1222_v41 = vadd.f32 %v1145_v45, %v3614_v51  ;;  %v1165_v16 = vpop.permute.xlu0 %1164  ;;  %v3619_v58 = vmax.f32 %v2976_v54, 0.0 }
 0x135   : > { %v3110_v33 = vadd.f32 %v1165_v16, %v3615_v60  ;;  %v3113_v4 = vadd.f32 %v1165_v16, %v3616_v46  ;;  %v3116_v44 = vadd.f32 %v1165_v16, %v3617_v10  ;;  %v3119_v30 = vadd.f32 %v1165_v16, %v3618_v39 }
 0x136   : > { %v1359_v48 = vpop.permute.xlu1 %1358  ;;  %v1283_v28 = vmax.f32 %v1219_v61, 0.0  ;;  %v1284_v37 = vmax.f32 %v1220_v0, 0.0  ;;  %v1285_v20 = vmax.f32 %v1221_v7, 0.0  ;;  %v1286_v51 = vmax.f32 %v1222_v41, 0.0 }
 0x137   : > { %v1435_v10 = vmul.f32 %v1359_v48, %v3619_v58  ;;  %v1436_v39 = vmul.f32 %v1359_v48, %v3620_v5  ;;  %v3621_v16 = vmax.f32 %v2982_v22, 0.0  ;;  %v3622_v61 = vmax.f32 %v2985_v2, 0.0 }
 0x138   : > { %v1170_v7 = vpop.permute.xlu0 %1169 }
 0x139   : > { %v1437_v19 = vmul.f32 %v1359_v48, %v3621_v16  ;;  %v1438_v0 = vmul.f32 %v1359_v48, %v3622_v61  ;;  %v3135_v45 = vadd.f32 %v1170_v7, %v3043_v29  ;;  %v3138_v46 = vadd.f32 %v1170_v7, %v3046_v26 }
 0x13a   : > { %v3141_v54 = vadd.f32 %v1170_v7, %v3049_v17  ;;  %v1364_v21 = vpop.permute.xlu1 %1363  ;;  %v1495_v5 = vadd.f32 %v1435_v10, %v1431_v56  ;;  %v1516_v58 = vadd.f32 %v1436_v39, %v1432_v15  ;;  %v3144_v2 = vadd.f32 %v1170_v7, %v3071_v3  ;;  %v3624_v56 = vld [vmem:[#allocation111_spill] sm:$0xff]  ;;  %v3625_v15 = vld [vmem:[#allocation112_spill] sm:$0xff] }
 0x13b   : > { %v1537_v22 = vadd.f32 %v1437_v19, %v1433_v50  ;;  %v1558_v16 = vadd.f32 %v1438_v0, %v1434_v32  ;;  %v1303_v48 = vmax.f32 %v3135_v45, 0.0  ;;  %v1439_v41 = vmul.f32 %v1364_v21, %v1279_v6  ;;  %v3626_v50 = vld [vmem:[#allocation113_spill] sm:$0xff] }
 0x13c   : > { %v1440_v26 = vmul.f32 %v1364_v21, %v1280_v55  ;;  %v1441_v60 = vmul.f32 %v1364_v21, %v1281_v11  ;;  %v1442_v27 = vmul.f32 %v1364_v21, %v1282_v18  ;;  %v1175_v17 = vpop.permute.xlu0 %1174  ;;  %v1306_v11 = vmax.f32 %v3144_v2, 0.0 }
 0x13d   : > { %v3150_v35 = vadd.f32 %v1175_v17, %v3623_v38  ;;  %v3153_v19 = vadd.f32 %v1175_v17, %v3624_v56  ;;  %v3156_v3 = vadd.f32 %v1175_v17, %v3625_v15  ;;  %v3159_v32 = vadd.f32 %v1175_v17, %v3626_v50 }
 0x13e   : > { %v1369_v10 = vpop.permute.xlu1 %1368  ;;  %v1496_v39 = vadd.f32 %v1495_v5, %v1439_v41  ;;  %v1517_v0 = vadd.f32 %v1516_v58, %v1440_v26  ;;  %v1538_v6 = vadd.f32 %v1537_v22, %v1441_v60  ;;  %v1559_v55 = vadd.f32 %v1558_v16, %v1442_v27 }
 0x13f   : > { %v1307_v18 = vmax.f32 %v3150_v35, 0.0  ;;  %v1308_v38 = vmax.f32 %v3153_v19, 0.0  ;;  %v1309_v7 = vmax.f32 %v3156_v3, 0.0  ;;  %v1443_v21 = vmul.f32 %v1369_v10, %v1283_v28 }
 0x140   : > { %v1444_v56 = vmul.f32 %v1369_v10, %v1284_v37  ;;  %v1445_v15 = vmul.f32 %v1369_v10, %v1285_v20  ;;  %v1446_v29 = vmul.f32 %v1369_v10, %v1286_v51  ;;  %v1180_v61 = vpop.permute.xlu0 %1179  ;;  %v1310_v17 = vmax.f32 %v3159_v32, 0.0  ;;  %v3627_v20 = vld [vmem:[#allocation20_spill] sm:$0xff] }
 0x141   : > { %v1087_v41 = vadd.f32 %v2923_v24, %v3027_v47  ;;  %v1088_v27 = vadd.f32 %v2926_v36, %v3031_v25  ;;  %v1089_v60 = vadd.f32 %v2929_v1, %v3035_v63  ;;  %v1497_v58 = vadd.f32 %v1496_v39, %v1443_v21 }
 0x142   : > { %v1374_v5 = vpop.permute.xlu1 %1373  ;;  %v1518_v22 = vadd.f32 %v1517_v0, %v1444_v56  ;;  %v1539_v16 = vadd.f32 %v1538_v6, %v1445_v15  ;;  %v1560_v28 = vadd.f32 %v1559_v55, %v1446_v29  ;;  %v1090_v37 = vadd.f32 %v3627_v20, %v3039_v57  ;;  %v3636_v20 = vld [vmem:[#allocation108_spill] sm:$0xff] }
 0x143   : > { %v3174_v51 = vadd.f32 %v1180_v61, %v1087_v41  ;;  %v3176_v26 = vadd.f32 %v1180_v61, %v1088_v27  ;;  %v3178_v50 = vadd.f32 %v1180_v61, %v1089_v60  ;;  %v3628_v24 = vmax.f32 %v3052_v14, 0.0  ;;  %v3632_v41 = vld [vmem:[#allocation106_spill] sm:$0xff]  ;;  %v3634_v60 = vld [vmem:[#allocation107_spill] sm:$0xff] }
 0x144   : > { %v3629_v47 = vmax.f32 %v3055_v12, 0.0  ;;  %v3630_v25 = vmax.f32 %v3058_v59, 0.0  ;;  %v3631_v29 = vmax.f32 %v3061_v42, 0.0  ;;  %v1185_v39 = vpop.permute.xlu0 %1184  ;;  %v3188_v57 = vadd.f32 %v1180_v61, %v1090_v37  ;;  %v3633_v59 = vld [vmem:[#allocation90_spill] sm:$0xff]  ;;  %v3635_v42 = vld [vmem:[#allocation91_spill] sm:$0xff]  ;;  %v3637_v61 = vld [vmem:[#allocation92_spill] sm:$0xff] }
 0x145   : > { %v1447_v36 = vmul.f32 %v1374_v5, %v3628_v24  ;;  %v1311_v0 = vmax.f32 %v3174_v51, 0.0  ;;  %v1312_v6 = vmax.f32 %v3176_v26, 0.0  ;;  %v1091_v27 = vadd.f32 %v3633_v59, %v3632_v41  ;;  %v3638_v24 = vld [vmem:[#allocation109_spill] sm:$0xff] }
 0x146   : > { %v1448_v1 = vmul.f32 %v1374_v5, %v3629_v47  ;;  %v1449_v63 = vmul.f32 %v1374_v5, %v3630_v25  ;;  %v1450_v10 = vmul.f32 %v1374_v5, %v3631_v29  ;;  %v1379_v14 = vpop.permute.xlu1 %1378  ;;  %v1092_v5 = vadd.f32 %v3635_v42, %v3634_v60  ;;  %v3639_v47 = vld [vmem:[#allocation94_spill] sm:$0xff] }
 0x147   : > { %v1498_v21 = vadd.f32 %v1497_v58, %v1447_v36  ;;  %v1093_v37 = vadd.f32 %v3637_v61, %v3636_v20  ;;  %v1094_v25 = vadd.f32 %v3639_v47, %v3638_v24  ;;  %v3640_v29 = vmax.f32 %v3074_v62, 0.0  ;;  %v3644_v47 = vld [vmem:[#allocation12_spill] sm:$0xff] }
 0x148   : > { %v1519_v56 = vadd.f32 %v1518_v22, %v1448_v1  ;;  %v1540_v12 = vadd.f32 %v1539_v16, %v1449_v63  ;;  %v1561_v15 = vadd.f32 %v1560_v28, %v1450_v10  ;;  %v3641_v58 = vmax.f32 %v3077_v34, 0.0  ;;  %v1190_v63 = vpop.permute.xlu0 %1189 }
 0x149   : > { %v1451_v55 = vmul.f32 %v1379_v14, %v3640_v29  ;;  %v3642_v16 = vmax.f32 %v3080_v53, 0.0  ;;  %v3643_v36 = vmax.f32 %v3083_v9, 0.0  ;;  %v1314_v10 = vmax.f32 %v3188_v57, 0.0  ;;  %v3689_v9 = vld [vmem:[#allocation11_spill] sm:$0xff] }
 0x14a   : > { %v1452_v22 = vmul.f32 %v1379_v14, %v3641_v58  ;;  %v3210_v41 = vadd.f32 %v1185_v39, %v1091_v27  ;;  %v3212_v59 = vadd.f32 %v1185_v39, %v1092_v5  ;;  %v3214_v60 = vadd.f32 %v1185_v39, %v1093_v37  ;;  %v1384_v62 = vpop.permute.xlu1 %1383  ;;  %v3645_v27 = vld [vmem:[#allocation59_spill] sm:$0xff]  ;;  %v3646_v5 = vld [vmem:[#allocation13_spill] sm:$0xff]  ;;  %v3647_v58 = vld [vmem:[#allocation60_spill] sm:$0xff] }
 0x14b   : > { %v1453_v28 = vmul.f32 %v1379_v14, %v3642_v16  ;;  %v1454_v1 = vmul.f32 %v1379_v14, %v3643_v36  ;;  %v1499_v42 = vadd.f32 %v1498_v21, %v1451_v55  ;;  %v3216_v24 = vadd.f32 %v1185_v39, %v1094_v25  ;;  %v3648_v16 = vld [vmem:[#allocation14_spill] sm:$0xff]  ;;  %v3649_v36 = vld [vmem:[#allocation61_spill] sm:$0xff]  ;;  %v3650_v21 = vld [vmem:[#allocation19_spill] sm:$0xff] }
 0x14c   : > { %v1520_v20 = vadd.f32 %v1519_v56, %v1452_v22  ;;  %v1315_v53 = vmax.f32 %v3210_v41, 0.0  ;;  %v867_v29 = vadd.f32 %v3645_v27, %v3644_v47  ;;  %v868_v37 = vadd.f32 %v3647_v58, %v3646_v5  ;;  %v3651_v56 = vld [vmem:[#allocation62_spill] sm:$0xff]  ;;  %v1195_v14 = vpop.permute.xlu0 %1194 }
 0x14d   : > { %v1541_v34 = vadd.f32 %v1540_v12, %v1453_v28  ;;  %v1562_v61 = vadd.f32 %v1561_v15, %v1454_v1  ;;  %v869_v55 = vadd.f32 %v3649_v36, %v3648_v16  ;;  %v870_v12 = vadd.f32 %v3651_v56, %v3650_v21 }
 0x14e   : > { %v3652_v39 = vmax.f32 %v3094_v8, 0.0  ;;  %v3653_v25 = vmax.f32 %v3096_v23, 0.0  ;;  %v3654_v28 = vmax.f32 %v3098_v43, 0.0  ;;  %v3655_v47 = vmax.f32 %v3100_v31, 0.0  ;;  %v1389_v5 = vpop.permute.xlu1 %1388 }
 0x14f   : > { %v1095_v58 = vadd.f32 %v2967_v49, %v867_v29  ;;  %v1096_v16 = vadd.f32 %v2970_v52, %v868_v37  ;;  %v1097_v36 = vadd.f32 %v2973_v13, %v869_v55  ;;  %v1098_v8 = vadd.f32 %v2996_v40, %v870_v12  ;;  %v3657_v49 = vld [vmem:[#allocation95_spill] sm:$0xff]  ;;  %v3658_v52 = vld [vmem:[#allocation8_spill] sm:$0xff]  ;;  %v3660_v55 = vld [vmem:[#allocation9_spill] sm:$0xff] }
 0x150   : > { %v1455_v15 = vmul.f32 %v1384_v62, %v3652_v39  ;;  %v1456_v22 = vmul.f32 %v1384_v62, %v3653_v25  ;;  %v1457_v1 = vmul.f32 %v1384_v62, %v3654_v28  ;;  %v1458_v27 = vmul.f32 %v1384_v62, %v3655_v47  ;;  %v3656_v28 = vld [vmem:[#allocation7_spill] sm:$0xff]  ;;  %v3659_v37 = vld [vmem:[#allocation96_spill] sm:$0xff]  ;;  %v3661_v40 = vld [vmem:[#allocation97_spill] sm:$0xff] }
 0x151   : > { %v3241_v25 = vadd.f32 %v1190_v63, %v1095_v58  ;;  %v3243_v43 = vadd.f32 %v1190_v63, %v1096_v16  ;;  %v3245_v31 = vadd.f32 %v1190_v63, %v1097_v36  ;;  %v3247_v62 = vadd.f32 %v1190_v63, %v1098_v8  ;;  %v1200_v36 = vpop.permute.xlu0 %1199  ;;  %v3669_v63 = vld [vmem:[#allocation67_spill] sm:$0xff] }
 0x152   : > { %v1500_v21 = vadd.f32 %v1499_v42, %v1455_v15  ;;  %v1521_v56 = vadd.f32 %v1520_v20, %v1456_v22  ;;  %v1542_v23 = vadd.f32 %v1541_v34, %v1457_v1  ;;  %v1563_v39 = vadd.f32 %v1562_v61, %v1458_v27  ;;  %v3662_v20 = vld [vmem:[#allocation10_spill] sm:$0xff]  ;;  %v1394_v12 = vpop.permute.xlu1 %1393  ;;  %v3671_v22 = vld [vmem:[#allocation68_spill] sm:$0xff] }
 0x153   : > { %v1099_v29 = vadd.f32 %v3657_v49, %v3656_v28  ;;  %v1100_v13 = vadd.f32 %v3659_v37, %v3658_v52  ;;  %v1101_v42 = vadd.f32 %v3661_v40, %v3660_v55  ;;  %v3663_v34 = vld [vmem:[#allocation102_spill] sm:$0xff]  ;;  %v3664_v8 = vmax.f32 %v3110_v33, 0.0 }
 0x154   : > { %v1102_v61 = vadd.f32 %v3663_v34, %v3662_v20  ;;  %v3665_v49 = vmax.f32 %v3113_v4, 0.0  ;;  %v3666_v37 = vmax.f32 %v3116_v44, 0.0  ;;  %v3667_v40 = vmax.f32 %v3119_v30, 0.0 }
 0x155   : > { %v3262_v27 = vadd.f32 %v1195_v14, %v1099_v29  ;;  %v3264_v58 = vadd.f32 %v1195_v14, %v1100_v13  ;;  %v3266_v16 = vadd.f32 %v1195_v14, %v1101_v42  ;;  %v1459_v28 = vmul.f32 %v1389_v5, %v3664_v8  ;;  %v3675_v29 = vld [vmem:[#allocation70_spill] sm:$0xff]  ;;  %v3684_v13 = vld [vmem:[#allocation16_spill] sm:$0xff] }
 0x156   : > { %v1460_v52 = vmul.f32 %v1389_v5, %v3665_v49  ;;  %v1461_v55 = vmul.f32 %v1389_v5, %v3666_v37  ;;  %v1462_v20 = vmul.f32 %v1389_v5, %v3667_v40  ;;  %v3276_v34 = vadd.f32 %v1195_v14, %v1102_v61  ;;  %v1399_v47 = vpop.permute.xlu1 %1398  ;;  %v3668_v49 = vld [vmem:[#allocation21_spill] sm:$0xff]  ;;  %v3670_v37 = vld [vmem:[#allocation22_spill] sm:$0xff]  ;;  %v3672_v5 = vld [vmem:[#allocation79_spill] sm:$0xff] }
 0x157   : > { %v1501_v33 = vadd.f32 %v1500_v21, %v1459_v28  ;;  %v875_v44 = vadd.f32 %v3669_v63, %v3668_v49  ;;  %v876_v30 = vadd.f32 %v3671_v22, %v3670_v37  ;;  %v3673_v14 = vld [vmem:[#allocation69_spill] sm:$0xff]  ;;  %v3674_v40 = vld [vmem:[#allocation80_spill] sm:$0xff]  ;;  %v1463_v42 = vmul.f32 %v1394_v12, %v1303_v48  ;;  %v1205_v37 = vpop.permute.xlu0 %1204 }
 0x158   : > { %v1522_v8 = vadd.f32 %v1521_v56, %v1460_v52  ;;  %v1543_v1 = vadd.f32 %v1542_v23, %v1461_v55  ;;  %v1564_v4 = vadd.f32 %v1563_v39, %v1462_v20  ;;  %v877_v61 = vadd.f32 %v3673_v14, %v3672_v5  ;;  %v3678_v28 = vld [vmem:[#allocation85_spill] sm:$0xff]  ;;  %v3679_v55 = vld [vmem:[#allocation23_spill] sm:$0xff]  ;;  %v3680_v49 = vld [vmem:[#allocation24_spill] sm:$0xff] }
 0x159   : > { %v878_v15 = vadd.f32 %v3675_v29, %v3674_v40  ;;  %v3676_v21 = vmax.f32 %v3138_v46, 0.0  ;;  %v3677_v23 = vmax.f32 %v3141_v54, 0.0  ;;  %v1466_v63 = vmul.f32 %v1394_v12, %v1306_v11  ;;  %v3681_v40 = vld [vmem:[#allocation25_spill] sm:$0xff]  ;;  %v3682_v11 = vld [vmem:[#allocation15_spill] sm:$0xff] }
 0x15a   : > { %v1103_v52 = vadd.f32 %v3678_v28, %v875_v44  ;;  %v1104_v20 = vadd.f32 %v3679_v55, %v876_v30  ;;  %v1105_v29 = vadd.f32 %v3680_v49, %v877_v61  ;;  %v1404_v45 = vpop.permute.xlu1 %1403  ;;  %v1502_v48 = vadd.f32 %v1501_v33, %v1463_v42  ;;  %v3685_v44 = vld [vmem:[#allocation104_spill] sm:$0xff]  ;;  %v3686_v30 = vld [vmem:[#allocation17_spill] sm:$0xff]  ;;  %v3688_v49 = vld [vmem:[#allocation18_spill] sm:$0xff] }
 0x15b   : > { %v1464_v56 = vmul.f32 %v1394_v12, %v3676_v21  ;;  %v1465_v39 = vmul.f32 %v1394_v12, %v3677_v23  ;;  %v1565_v14 = vadd.f32 %v1564_v4, %v1466_v63  ;;  %v1106_v54 = vadd.f32 %v3681_v40, %v878_v15  ;;  %v3683_v12 = vld [vmem:[#allocation103_spill] sm:$0xff]  ;;  %v3687_v55 = vld [vmem:[#allocation105_spill] sm:$0xff]  ;;  %v1424_v35 = vpop.permute.xlu0 %1423 }
 0x15c   : > { %v1263_v21 = vadd.f32 %v1200_v36, %v1103_v52  ;;  %v1264_v23 = vadd.f32 %v1200_v36, %v1104_v20  ;;  %v1265_v2 = vadd.f32 %v1200_v36, %v1105_v29  ;;  %v1107_v22 = vadd.f32 %v3683_v12, %v3682_v11 }
 0x15d   : > { %v1523_v5 = vadd.f32 %v1522_v8, %v1464_v56  ;;  %v1544_v46 = vadd.f32 %v1543_v1, %v1465_v39  ;;  %v1108_v28 = vadd.f32 %v3685_v44, %v3684_v13  ;;  %v1109_v61 = vadd.f32 %v3687_v55, %v3686_v30 }
 0x15e   : > { %v1110_v42 = vadd.f32 %v3689_v9, %v3688_v49  ;;  %v1467_v1 = vmul.f32 %v1399_v47, %v1307_v18  ;;  %v1468_v15 = vmul.f32 %v1399_v47, %v1308_v38  ;;  %v1469_v33 = vmul.f32 %v1399_v47, %v1309_v7  ;;  %v1409_v4 = vpop.permute.xlu1 %1408 }
 0x15f   : > { %v1470_v8 = vmul.f32 %v1399_v47, %v1310_v17  ;;  %v1266_v13 = vadd.f32 %v1200_v36, %v1106_v54  ;;  %v1267_v56 = vadd.f32 %v1205_v37, %v1107_v22  ;;  %v1268_v39 = vadd.f32 %v1205_v37, %v1108_v28 }
 0x160   : > { %v1269_v63 = vadd.f32 %v1205_v37, %v1109_v61  ;;  %v1503_v52 = vadd.f32 %v1502_v48, %v1467_v1  ;;  %v1524_v20 = vadd.f32 %v1523_v5, %v1468_v15  ;;  %v1545_v9 = vadd.f32 %v1544_v46, %v1469_v33 }
 0x161   : > { %v1566_v29 = vadd.f32 %v1565_v14, %v1470_v8  ;;  %v1270_v18 = vadd.f32 %v1205_v37, %v1110_v42  ;;  %v1327_v40 = vmax.f32 %v1263_v21, 0.0  ;;  %v1328_v19 = vmax.f32 %v1264_v23, 0.0 }
 0x162   : > { %v1329_v38 = vmax.f32 %v1265_v2, 0.0  ;;  %v1471_v3 = vmul.f32 %v1404_v45, %v1311_v0  ;;  %v1472_v32 = vmul.f32 %v1404_v45, %v1312_v6  ;;  %v3690_v7 = vmax.f32 %v3178_v50, 0.0  ;;  %v1414_v36 = vpop.permute.xlu1 %1413 }
 0x163   : > { %v1474_v47 = vmul.f32 %v1404_v45, %v1314_v10  ;;  %v1330_v22 = vmax.f32 %v1266_v13, 0.0  ;;  %v1487_v48 = vmul.f32 %v1424_v35, %v1327_v40  ;;  %v1488_v5 = vmul.f32 %v1424_v35, %v1328_v19 }
 0x164   : > { %v1473_v17 = vmul.f32 %v1404_v45, %v3690_v7  ;;  %v1489_v37 = vmul.f32 %v1424_v35, %v1329_v38  ;;  %v1504_v46 = vadd.f32 %v1503_v52, %v1471_v3  ;;  %v1525_v14 = vadd.f32 %v1524_v20, %v1472_v32 }
 0x165   : > { %v1567_v21 = vadd.f32 %v1566_v29, %v1474_v47  ;;  %v1475_v51 = vmul.f32 %v1409_v4, %v1315_v53  ;;  %v3691_v26 = vmax.f32 %v3212_v59, 0.0  ;;  %v3692_v50 = vmax.f32 %v3214_v60, 0.0 }
 0x166   : > { %v1546_v54 = vadd.f32 %v1545_v9, %v1473_v17  ;;  %v3693_v57 = vmax.f32 %v3216_v24, 0.0  ;;  %v3694_v45 = vmax.f32 %v3241_v25, 0.0  ;;  %v3695_v2 = vmax.f32 %v3243_v43, 0.0  ;;  %v1419_v59 = vpop.permute.xlu1 %1418 }
 0x167   : > { %v1476_v0 = vmul.f32 %v1409_v4, %v3691_v26  ;;  %v1477_v6 = vmul.f32 %v1409_v4, %v3692_v50  ;;  %v3696_v12 = vmax.f32 %v3245_v31, 0.0  ;;  %v3697_v41 = vmax.f32 %v3247_v62, 0.0 }
 0x168   : > { %v1478_v10 = vmul.f32 %v1409_v4, %v3693_v57  ;;  %v1479_v23 = vmul.f32 %v1414_v36, %v3694_v45  ;;  %v1480_v11 = vmul.f32 %v1414_v36, %v3695_v2  ;;  %v1505_v28 = vadd.f32 %v1504_v46, %v1475_v51 }
 0x169   : > { %v1481_v44 = vmul.f32 %v1414_v36, %v3696_v12  ;;  %v1482_v53 = vmul.f32 %v1414_v36, %v3697_v41  ;;  %v1526_v30 = vadd.f32 %v1525_v14, %v1476_v0  ;;  %v1547_v60 = vadd.f32 %v1546_v54, %v1477_v6 }
 0x16a   : > { %v1568_v55 = vadd.f32 %v1567_v21, %v1478_v10  ;;  %v3698_v24 = vmax.f32 %v3262_v27, 0.0  ;;  %v3699_v25 = vmax.f32 %v3264_v58, 0.0  ;;  %v3700_v43 = vmax.f32 %v3266_v16, 0.0  ;;  %v1429_v13 = vpop.permute.xlu1 %1428 }
 0x16b   : > { %v3701_v31 = vmax.f32 %v3276_v34, 0.0  ;;  %v1506_v15 = vadd.f32 %v1505_v28, %v1479_v23  ;;  %v1527_v62 = vadd.f32 %v1526_v30, %v1480_v11  ;;  %v1548_v33 = vadd.f32 %v1547_v60, %v1481_v44 }
 0x16c   : > { %v1483_v61 = vmul.f32 %v1419_v59, %v3698_v24  ;;  %v1484_v49 = vmul.f32 %v1419_v59, %v3699_v25  ;;  %v1485_v42 = vmul.f32 %v1419_v59, %v3700_v43  ;;  %v1569_v8 = vadd.f32 %v1568_v55, %v1482_v53 }
 0x16d   : > { %v1486_v1 = vmul.f32 %v1419_v59, %v3701_v31  ;;  %v1490_v4 = vmul.f32 %v1424_v35, %v1330_v22  ;;  %v1331_v52 = vmax.f32 %v1267_v56, 0.0  ;;  %v1332_v20 = vmax.f32 %v1268_v39, 0.0 }
 0x16e   : > { %v1333_v9 = vmax.f32 %v1269_v63, 0.0  ;;  %v1507_v27 = vadd.f32 %v1506_v15, %v1483_v61  ;;  %v1528_v29 = vadd.f32 %v1527_v62, %v1484_v49  ;;  %v1549_v40 = vadd.f32 %v1548_v33, %v1485_v42  ;;  %v3702_v61 = vld [vmem:[#allocation6_spill] sm:$0xff] }
 0x16f   : > { %v1570_v58 = vadd.f32 %v1569_v8, %v1486_v1  ;;  %v1334_v19 = vmax.f32 %v1270_v18, 0.0  ;;  %v1491_v38 = vmul.f32 %v1429_v13, %v1331_v52  ;;  %v1492_v16 = vmul.f32 %v1429_v13, %v1332_v20 }
 0x170   : > { %v1493_v3 = vmul.f32 %v1429_v13, %v1333_v9  ;;  %v1508_v32 = vadd.f32 %v1507_v27, %v1487_v48  ;;  %v1529_v34 = vadd.f32 %v1528_v29, %v1488_v5  ;;  %v1550_v7 = vadd.f32 %v1549_v40, %v1489_v37 }
 0x171   : > { %v1571_v17 = vadd.f32 %v1570_v58, %v1490_v4  ;;  %v1494_v47 = vmul.f32 %v1429_v13, %v1334_v19  ;;  %v1827_v37 = vmov 1966171168   ;;  %v1580_v44 = vstv %s1579_s27 }
 0x172   : > { %v1509_v36 = vadd.f32 %v1508_v32, %v1491_v38  ;;  %v1530_v46 = vadd.f32 %v1529_v34, %v1492_v16  ;;  %v1551_v35 = vadd.f32 %v1550_v7, %v1493_v3  ;;  %v1592_v0 = vunpack.c.l.s4 %v1827_v37 }
 0x173   : > { %v1572_v22 = vadd.f32 %v1571_v17, %v1494_v47  ;;  %v3703_v62 = vlaneseq }
 0x174   : > { %v1510_v56 = vrot.slane %v1509_v36, 4  ;;  %v1531_v39 = vrot.slane %v1530_v46, 4  ;;  %v1552_v63 = vrot.slane %v1551_v35, 4  ;;  %v1593_v12 = vunpack.c.0.s8 %v1592_v0 }
 0x175   : > { %v1573_v14 = vrot.slane %v1572_v22, 4  ;;  %vm1616_vm0 = vcmp.lt.s32.totalorder %v3703_v62, 512 }
 0x176   : > { %v1511_v54 = vadd.f32 %v1510_v56, %v1509_v36  ;;  %v1532_v21 = vadd.f32 %v1531_v39, %v1530_v46  ;;  %v1553_v18 = vadd.f32 %v1552_v63, %v1551_v35  ;;  %v1596_v25 = vsub.s32 %v1593_v12, %v3702_v61 }
 0x177   : > { %v1574_v51 = vadd.f32 %v1573_v14, %v1572_v22 }
 0x178   : > { %v1512_v26 = vrot.slane %v1511_v54, 2  ;;  %v1533_v48 = vrot.slane %v1532_v21, 2  ;;  %v1554_v5 = vrot.slane %v1553_v18, 2 }
 0x179   : > { %v1575_v50 = vrot.slane %v1574_v51, 2 }
 0x17a   : > { %v1513_v6 = vadd.f32 %v1512_v26, %v1511_v54  ;;  %v1534_v57 = vadd.f32 %v1533_v48, %v1532_v21  ;;  %v1555_v10 = vadd.f32 %v1554_v5, %v1553_v18 }
 0x17b   : > { %v1576_v45 = vadd.f32 %v1575_v50, %v1574_v51 }
 0x17c   : > { %v1514_v23 = vrot.slane %v1513_v6, 1  ;;  %v1535_v2 = vrot.slane %v1534_v57, 1  ;;  %v1556_v11 = vrot.slane %v1555_v10, 1 }
 0x17d   : > { %v1577_v41 = vrot.slane %v1576_v45, 1 }
 0x17e   : > { %v1515_v53 = vadd.f32 %v1514_v23, %v1513_v6  ;;  %v1536_v59 = vadd.f32 %v1535_v2, %v1534_v57  ;;  %v1557_v28 = vadd.f32 %v1556_v11, %v1555_v10 }
 0x17f   : > { %v1578_v30 = vadd.f32 %v1577_v41, %v1576_v45 }
 0x180   : > { %v1581_v60 = vadd.f32 %v1580_v44, %v1515_v53  ;;  %v1582_v55 = vadd.f32 %v1580_v44, %v1536_v59  ;;  %v1583_v24 = vadd.f32 %v1580_v44, %v1557_v28 }
 0x181   : > { %v1584_v49 = vadd.f32 %v1580_v44, %v1578_v30 }
 0x182   : > { %v1589_v43 = vcombine.low %v1581_v60, %v1582_v55 }
 0x183   : > { %v1590_v42 = vcombine.low %v1583_v24, %v1584_v49 }
 0x184   : > { %v1597_v31 = vrot.slane %v1589_v43, %v1596_v25 }
 0x185   : > { %v1604_v1 = vrot.slane %v1590_v42, %v1596_v25 }
 0x187   : > { %v1605_v15 = vcombine.low %v1597_v31, %v1604_v1 }
 0x189   : > { %v1612_v33 = vrot.slane %v1605_v15, %v1596_v25 }
 0x18b   : > { %1618 = vst.msk [vmem:[%s219_s9] sm:$0xf] %vm1616_vm0, %v1612_v33 }
 0x18c   : > { %1772 = shalt.err (!%p1769_p3)
}
 0x18d   : > { %s1773_s18 = scalar_lea.hbm %s3357_s13, 64  ;;  %s1777_s26 = scalar_lea.hbm %s3404_s5, 128 }
 0x18e   : > { %p1774_p4 = scmp.ne.s32.totalorder %s3357_s13, %s1773_s18  ;;  %p1778_p9 = scmp.lt.u32.totalorder %s3357_s13, %s3404_s5 }
 0x18f   : > { %p1779_p10 = scmp.lt.u32.totalorder %s1777_s26, %s1773_s18  ;;  %p1781_p12 = scmp.lt.u32.totalorder %s1773_s18, %s3357_s13 }
 0x190   : > { %p1775_p7 = pnand %p1774_p4, %p1900_p5 }
 0x191   : > { %p1780_p11 = por %p1779_p10, %p1778_p9 }
 0x192   : > { %p1776_p8 = pneg %p1775_p7 }
 0x193   : > { %p1782_p13 = por %p1781_p12, %p1780_p11 }
 0x195   : > { %p1783_p0 = pnand %p1782_p13, %p1776_p8 }
 0x197   : > { %1786 = shalt.err (!%p1783_p0)
}
 0x198   : > { %1706 = dma.vmem_to_hbm [thread:$0]  (%p1900_p5), %s3359_s10, 64, %s3357_s13, %s1620_s14  }
 0x199 PF: > { %p1712_p1 = scmp.ge.s32.totalorder %s1821_s23, 2  ;;  %s1646_s7 = sand.u32 1, %s1809_s20  }
 0x19a   : > { %s1647_s8 = scalar_lea.sflag [#allocation4], %s1646_s7 }
 0x19b   : > { %p1709_p2 = pnand %p1712_p1, %p1904_p6 }
 0x19d   : > { %1804 = dma.done.wait (!%p1709_p2), %s1647_s8, 64  }
 0x19e   : > { %1806 = vsyncadd (!%p1709_p2), %s1647_s8, 4294967232  ;;  %p16_p3 = scmp.ge.s32.totalorder %s1887_s25, 4   ;;  %s3704_s20 = smov %s1813_s21 }
 0x19f   : > { %s3705_s21 = smov %s1817_s22  ;;  %s3706_s22 = smov %s1898_s28 }
 0x1a0   : > { %s3707_s23 = smov %s1887_s25  ;;  %18 = sbr.rel (!%p16_p3) target bundleno = 5 (0x5), region = 75 }
 0x1a7   :  { %1652 = vsyncpa [#allocation4], 1 }
 0x1a8   :  { %1654 = vsyncpa [#allocation4 + $0x1], 1 }

</bundles_post_ra>
